<compile_context>
chip_gen: v7x
topology: tpu7x:2x2x1
jax: 0.10.0
libtpu: 0.0.40
codegen_flags: <defaults>
</compile_context>

<pallas_src>
import jax
import jax.numpy as jnp
from jax.experimental import pallas as pl
from jax.experimental.pallas import tpu as pltpu

VMEM = pltpu.MemorySpace.VMEM


# ----------------------------- fused Pallas kernel -----------------------------

def _tsnet_kernel(xproj_ref, w_ref, o_ref):
    """xproj_ref: (T, B, 4H) f32  = x @ W_ih1 + b1   (hoisted off the recurrence)
       w_ref:     (4H + 8, 4H) f32 packed slab:
                  rows [0, H)     : W_hh1                     (H, 4H)
                  rows [H, 3H)    : [W_ih2 ; W_hh2] stacked   (2H, 4H)
                  rows [3H, 4H)   : fc weight, lane-padded    (H, 4H)
                  rows [4H, 4H+8) : row 0 = b2, row 1 = fc bias (lane-padded)
       o_ref:     (B, 4H) f32 — fc output, lane-padded (cols >= num_features are zero)
    """
    T, B = xproj_ref.shape[0], xproj_ref.shape[1]
    G = w_ref.shape[1]              # 4*H == 128 -> one lane row
    H = G // 4

    # ---- one-time weight unpack (static slices); matmul operands cast to bf16 ----
    whh1 = w_ref[0:H, :].astype(jnp.bfloat16)            # (H, 4H)
    w2 = w_ref[H:3 * H, :].astype(jnp.bfloat16)          # (2H, 4H) = [W_ih2; W_hh2]
    fcw = w_ref[3 * H:4 * H, :]                          # (H, 4H), f32 (single tail matmul)
    bias_blk = w_ref[4 * H:4 * H + 8, :]                 # (8, 4H)
    b2 = bias_blk[0:1, :]                                # (1, 4H) = b_ih2 + b_hh2
    fcb = bias_blk[1:2, :]                               # (1, 4H), lane-padded fc bias

    # ---- loop-invariant constants, hoisted (JAX does not CSE broadcasts) ----
    # PyTorch gate order along the 4H lanes: i, f, g, o. sigmoid(x) = 0.5*tanh(0.5*x)+0.5
    # -> pre-scale 0.5 on i/f/o lanes, 1.0 on g lanes; post affine (same scale, +0.5 shift).
    lane = jax.lax.broadcasted_iota(jnp.int32, (1, G), 1)
    is_g = jnp.logical_and(lane >= 2 * H, lane < 3 * H)
    scale = jnp.where(is_g, 1.0, 0.5).astype(jnp.float32)
    shift = jnp.where(is_g, 0.0, 0.5).astype(jnp.float32)
    scale_b = jnp.broadcast_to(scale, (B, G))
    shift_b = jnp.broadcast_to(shift, (B, G))
    b2_b = jnp.broadcast_to(b2, (B, G))

    def lstm_cell(gates, c_prev):
        # ONE full-width EUP tanh over all 4 gates + VPU affine fixup, then one tanh(c).
        t = jnp.tanh(gates * scale_b)
        tf = t * scale_b + shift_b
        i = tf[:, 0:H]
        f = tf[:, H:2 * H]
        g = tf[:, 2 * H:3 * H]
        o = tf[:, 3 * H:4 * H]
        c = f * c_prev + i * g
        h = o * jnp.tanh(c)
        return h, c

    zeros = jnp.zeros((B, H), jnp.float32)
    h1, c1, h2, c2 = zeros, zeros, zeros, zeros

    # T is small & static -> fully unrolled; h/c carries stay in f32 vregs.
    for t_step in range(T):
        xp_t = xproj_ref[t_step]                                       # (B, 4H), f32
        g1 = xp_t + jnp.dot(h1.astype(jnp.bfloat16), whh1,
                            preferred_element_type=jnp.float32)
        h1, c1 = lstm_cell(g1, c1)
        h12 = jnp.concatenate([h1, h2], axis=1).astype(jnp.bfloat16)   # (B, 2H)
        g2 = jnp.dot(h12, w2, preferred_element_type=jnp.float32) + b2_b
        h2, c2 = lstm_cell(g2, c2)

    # fc1 on the final timestep only (== fc1(seq)[:, -1, :]); lane-dense padded output.
    o_ref[...] = jnp.dot(h2, fcw, preferred_element_type=jnp.float32) + fcb


# ----------------------------- wrapper -----------------------------

def timeseries_testnet_forward(x_btf, kp):
    """x_btf: (B, T, num_features) float32, batch_first like the PyTorch module.
       kp: dict with 'wih1' (F, 4H), 'b1' (1, 4H), 'slab' (4H+8, 4H) from pack_params().
    """
    B, T, F = x_btf.shape
    G = kp["slab"].shape[1]                       # 4H
    # Hoisted layer-1 input projection: off the recurrence critical path, absorbs the
    # old transpose/pad wrapper ops, delivers a time-major, lane-dense (T, B, 4H) operand.
    xproj = jnp.einsum("btf,fg->tbg", x_btf.astype(jnp.float32), kp["wih1"]) + kp["b1"]
    out_pad = pl.pallas_call(
        _tsnet_kernel,
        out_shape=jax.ShapeDtypeStruct((B, G), jnp.float32),
        in_specs=[pl.BlockSpec(memory_space=VMEM)] * 2,
        out_specs=pl.BlockSpec(memory_space=VMEM),
    )(xproj, kp["slab"])
    return out_pad[:, :F]                         # drop the fc lane padding


# ----------------------------- parameters -----------------------------

def init_params(key, *, hidden=32, num_features=3):
    """Raw (f32, PyTorch-layout-transposed) parameters, deterministic."""
    ks = jax.random.split(key, 10)
    bound = 1.0 / float(hidden) ** 0.5            # PyTorch LSTM / Linear(in=hidden) bound
    G = 4 * hidden

    def u(k, shape):
        return jax.random.uniform(k, shape, jnp.float32, -bound, bound)

    return {
        "wih1": u(ks[0], (num_features, G)),      # W_ih^1 transposed: (F, 4H)
        "whh1": u(ks[1], (hidden, G)),            # W_hh^1 transposed: (H, 4H)
        "b1":   u(ks[2], (1, G)) + u(ks[3], (1, G)),        # b_ih1 + b_hh1
        "wih2": u(ks[4], (hidden, G)),
        "whh2": u(ks[5], (hidden, G)),
        "b2":   u(ks[6], (1, G)) + u(ks[7], (1, G)),
        "fcw":  u(ks[8], (hidden, num_features)),            # Linear weight transposed
        "fcb":  u(ks[9], (1, num_features)),
    }


def pack_params(p):
    """Pack everything the kernel needs into 2 arrays: keep wih1/b1 for the hoisted
    input projection, and a single (4H+8, 4H) f32 slab for the in-kernel weights."""
    H, G = p["whh1"].shape
    F = p["fcw"].shape[1]
    fcw_pad = jnp.zeros((H, G), jnp.float32).at[:, :F].set(p["fcw"])
    bias_blk = jnp.zeros((8, G), jnp.float32)
    bias_blk = bias_blk.at[0, :].set(p["b2"][0])
    bias_blk = bias_blk.at[1, :F].set(p["fcb"][0])
    slab = jnp.concatenate([p["whh1"], p["wih2"], p["whh2"], fcw_pad, bias_blk], axis=0)
    return {"wih1": p["wih1"], "b1": p["b1"], "slab": slab}


# ----------------------------- pure-JAX reference -----------------------------

def reference_forward(x_btf, p, matmul_dtype=jnp.float32):
    """PyTorch-semantics reference. matmul_dtype=bfloat16 mimics the kernel's MXU
    operand quantization (f32 accumulation, f32 carries) for a tight check."""
    B, T, F = x_btf.shape
    H = p["whh1"].shape[0]

    def mm(a, b):
        return jnp.dot(a.astype(matmul_dtype), b.astype(matmul_dtype),
                       preferred_element_type=jnp.float32)

    def sigmoid(v):
        return 1.0 / (1.0 + jnp.exp(-v))

    def cell(g, c):
        i = sigmoid(g[:, 0 * H:1 * H])
        f = sigmoid(g[:, 1 * H:2 * H])
        gg = jnp.tanh(g[:, 2 * H:3 * H])
        o = sigmoid(g[:, 3 * H:4 * H])
        c = f * c + i * gg
        return o * jnp.tanh(c), c

    h1 = c1 = h2 = c2 = jnp.zeros((B, H), jnp.float32)
    for t in range(T):
        x_t = x_btf[:, t, :].astype(jnp.float32)
        # layer-1 input projection is f32 in the kernel path too (wrapper einsum)
        g1 = (jnp.dot(x_t, p["wih1"], preferred_element_type=jnp.float32) + p["b1"]
              + mm(h1, p["whh1"]))
        h1, c1 = cell(g1, c1)
        g2 = mm(h1, p["wih2"]) + mm(h2, p["whh2"]) + p["b2"]
        h2, c2 = cell(g2, c2)
    # fc head is f32 in the kernel as well
    return jnp.dot(h2, p["fcw"], preferred_element_type=jnp.float32) + p["fcb"]


# ----------------------------- main -----------------------------

if __name__ == "__main__":
    key = jax.random.PRNGKey(0)
    k_x, k_p = jax.random.split(key)
    B, T, F, H = 2, 8, 3, 32                     # batch, window_size, num_features, hidden

    raw = init_params(k_p, hidden=H, num_features=F)
    kparams = pack_params(raw)
    x = jax.random.normal(k_x, (B, T, F), dtype=jnp.float32)

    fwd = jax.jit(timeseries_testnet_forward)
    out = jax.block_until_ready(fwd(x, kparams))
    assert out.shape == (B, F), out.shape
    assert bool(jnp.all(jnp.isfinite(out)))

    # Tight check against a reference using the same bf16 MXU-operand quantization
    # (validates the kernel math itself).
    ref_bf16 = reference_forward(x, raw, matmul_dtype=jnp.bfloat16)
    assert bool(jnp.allclose(out, ref_bf16, atol=1e-3, rtol=1e-3)), (
        jnp.max(jnp.abs(out - ref_bf16)))

    # Check against the full-f32 PyTorch-semantics reference; the only deliberate
    # deviation is bf16 MXU operand rounding (f32 carries), bounded well below 5e-3 here.
    ref_f32 = reference_forward(x, raw, matmul_dtype=jnp.float32)
    assert bool(jnp.allclose(out, ref_f32, atol=5e-3, rtol=5e-3)), (
        jnp.max(jnp.abs(out - ref_f32)))

    print("KERNEL_OK")
</pallas_src>

<mosaic_0001>
module attributes {stable_mosaic.version = 11 : i64} {
  func.func @_tsnet_kernel(%arg0: memref<8x2x128xf32, #tpu.memory_space<vmem>>, %arg1: memref<136x128xf32, #tpu.memory_space<vmem>>, %arg2: memref<2x128xf32, #tpu.memory_space<vmem>>) attributes {dimension_semantics = [], scalar_prefetch = 0 : i64, scratch_operands = 0 : i64, tpu.core_type = #tpu.core_type<tc>} {
    %c0 = arith.constant 0 : index
    %c0_0 = arith.constant 0 : index
    %0 = vector.load %arg1[%c0, %c0_0] : memref<136x128xf32, #tpu.memory_space<vmem>>, vector<32x128xf32>
    %1 = arith.truncf %0 : vector<32x128xf32> to vector<32x128xbf16>
    %c32 = arith.constant 32 : index
    %c0_1 = arith.constant 0 : index
    %2 = vector.load %arg1[%c32, %c0_1] : memref<136x128xf32, #tpu.memory_space<vmem>>, vector<64x128xf32>
    %3 = arith.truncf %2 : vector<64x128xf32> to vector<64x128xbf16>
    %c96 = arith.constant 96 : index
    %c0_2 = arith.constant 0 : index
    %4 = vector.load %arg1[%c96, %c0_2] : memref<136x128xf32, #tpu.memory_space<vmem>>, vector<32x128xf32>
    %c128 = arith.constant 128 : index
    %c0_3 = arith.constant 0 : index
    %5 = vector.load %arg1[%c128, %c0_3] : memref<136x128xf32, #tpu.memory_space<vmem>>, vector<8x128xf32>
    %6 = vector.extract_strided_slice %5 {offsets = [0, 0], sizes = [1, 128], strides = [1, 1]} : vector<8x128xf32> to vector<1x128xf32>
    %7 = vector.extract_strided_slice %5 {offsets = [1, 0], sizes = [1, 128], strides = [1, 1]} : vector<8x128xf32> to vector<1x128xf32>
    %8 = tpu.iota {dimensions = array<i32: 1>} : vector<1x128xi32>
    %c64_i32 = arith.constant 64 : i32
    %9 = vector.broadcast %c64_i32 : i32 to vector<1x128xi32>
    %10 = arith.cmpi sge, %8, %9 : vector<1x128xi32>
    %c96_i32 = arith.constant 96 : i32
    %11 = vector.broadcast %c96_i32 : i32 to vector<1x128xi32>
    %12 = arith.cmpi slt, %8, %11 : vector<1x128xi32>
    %13 = arith.andi %10, %12 : vector<1x128xi1>
    %cst = arith.constant 1.000000e+00 : f32
    %cst_4 = arith.constant 5.000000e-01 : f32
    %14 = vector.broadcast %cst : f32 to vector<1x128xf32>
    %15 = vector.broadcast %cst_4 : f32 to vector<1x128xf32>
    %16 = arith.select %13, %14, %15 : vector<1x128xi1>, vector<1x128xf32>
    %cst_5 = arith.constant 0.000000e+00 : f32
    %cst_6 = arith.constant 5.000000e-01 : f32
    %17 = vector.broadcast %cst_5 : f32 to vector<1x128xf32>
    %18 = vector.broadcast %cst_6 : f32 to vector<1x128xf32>
    %19 = arith.select %13, %17, %18 : vector<1x128xi1>, vector<1x128xf32>
    %20 = vector.shape_cast %16 : vector<1x128xf32> to vector<1x128xf32>
    %21 = vector.broadcast %20 : vector<1x128xf32> to vector<2x128xf32>
    %22 = vector.shape_cast %19 : vector<1x128xf32> to vector<1x128xf32>
    %23 = vector.broadcast %22 : vector<1x128xf32> to vector<2x128xf32>
    %24 = vector.shape_cast %6 : vector<1x128xf32> to vector<1x128xf32>
    %25 = vector.broadcast %24 : vector<1x128xf32> to vector<2x128xf32>
    %cst_7 = arith.constant 0.000000e+00 : f32
    %26 = vector.broadcast %cst_7 : f32 to vector<2x32xf32>
    %c0_8 = arith.constant 0 : index
    %c0_9 = arith.constant 0 : index
    %c0_10 = arith.constant 0 : index
    %27 = vector.load %arg0[%c0_8, %c0_9, %c0_10] : memref<8x2x128xf32, #tpu.memory_space<vmem>>, vector<1x2x128xf32>
    %28 = vector.shape_cast %27 : vector<1x2x128xf32> to vector<2x128xf32>
    %29 = arith.truncf %26 : vector<2x32xf32> to vector<2x32xbf16>
    %cst_11 = arith.constant dense<0.000000e+00> : vector<2x128xf32>
    %30 = tpu.matmul %29, %1, %cst_11 {dimension_numbers = #tpu.dot_dimension_numbers<[1], [0], [0], [1], [0, 0, 1, 1], [], []>} : vector<2x32xbf16>, vector<32x128xbf16>, vector<2x128xf32> -> vector<2x128xf32>
    %31 = arith.addf %28, %30 : vector<2x128xf32>
    %32 = arith.mulf %31, %21 : vector<2x128xf32>
    %33 = math.tanh %32 : vector<2x128xf32>
    %34 = arith.mulf %33, %21 : vector<2x128xf32>
    %35 = arith.addf %34, %23 : vector<2x128xf32>
    %36 = vector.extract_strided_slice %35 {offsets = [0, 0], sizes = [2, 32], strides = [1, 1]} : vector<2x128xf32> to vector<2x32xf32>
    %37 = vector.extract_strided_slice %35 {offsets = [0, 32], sizes = [2, 32], strides = [1, 1]} : vector<2x128xf32> to vector<2x32xf32>
    %38 = vector.extract_strided_slice %35 {offsets = [0, 64], sizes = [2, 32], strides = [1, 1]} : vector<2x128xf32> to vector<2x32xf32>
    %39 = vector.extract_strided_slice %35 {offsets = [0, 96], sizes = [2, 32], strides = [1, 1]} : vector<2x128xf32> to vector<2x32xf32>
    %40 = arith.mulf %37, %26 : vector<2x32xf32>
    %41 = arith.mulf %36, %38 : vector<2x32xf32>
    %42 = arith.addf %40, %41 : vector<2x32xf32>
    %43 = math.tanh %42 : vector<2x32xf32>
    %44 = arith.mulf %39, %43 : vector<2x32xf32>
    %45 = tpu.concatenate %44, %26 in 1 : vector<2x32xf32>, vector<2x32xf32> -> vector<2x64xf32>
    %46 = arith.truncf %45 : vector<2x64xf32> to vector<2x64xbf16>
    %cst_12 = arith.constant dense<0.000000e+00> : vector<2x128xf32>
    %47 = tpu.matmul %46, %3, %cst_12 {dimension_numbers = #tpu.dot_dimension_numbers<[1], [0], [0], [1], [0, 0, 1, 1], [], []>} : vector<2x64xbf16>, vector<64x128xbf16>, vector<2x128xf32> -> vector<2x128xf32>
    %48 = arith.addf %47, %25 : vector<2x128xf32>
    %49 = arith.mulf %48, %21 : vector<2x128xf32>
    %50 = math.tanh %49 : vector<2x128xf32>
    %51 = arith.mulf %50, %21 : vector<2x128xf32>
    %52 = arith.addf %51, %23 : vector<2x128xf32>
    %53 = vector.extract_strided_slice %52 {offsets = [0, 0], sizes = [2, 32], strides = [1, 1]} : vector<2x128xf32> to vector<2x32xf32>
    %54 = vector.extract_strided_slice %52 {offsets = [0, 32], sizes = [2, 32], strides = [1, 1]} : vector<2x128xf32> to vector<2x32xf32>
    %55 = vector.extract_strided_slice %52 {offsets = [0, 64], sizes = [2, 32], strides = [1, 1]} : vector<2x128xf32> to vector<2x32xf32>
    %56 = vector.extract_strided_slice %52 {offsets = [0, 96], sizes = [2, 32], strides = [1, 1]} : vector<2x128xf32> to vector<2x32xf32>
    %57 = arith.mulf %54, %26 : vector<2x32xf32>
    %58 = arith.mulf %53, %55 : vector<2x32xf32>
    %59 = arith.addf %57, %58 : vector<2x32xf32>
    %60 = math.tanh %59 : vector<2x32xf32>
    %61 = arith.mulf %56, %60 : vector<2x32xf32>
    %c1 = arith.constant 1 : index
    %c0_13 = arith.constant 0 : index
    %c0_14 = arith.constant 0 : index
    %62 = vector.load %arg0[%c1, %c0_13, %c0_14] : memref<8x2x128xf32, #tpu.memory_space<vmem>>, vector<1x2x128xf32>
    %63 = vector.shape_cast %62 : vector<1x2x128xf32> to vector<2x128xf32>
    %64 = arith.truncf %44 : vector<2x32xf32> to vector<2x32xbf16>
    %cst_15 = arith.constant dense<0.000000e+00> : vector<2x128xf32>
    %65 = tpu.matmul %64, %1, %cst_15 {dimension_numbers = #tpu.dot_dimension_numbers<[1], [0], [0], [1], [0, 0, 1, 1], [], []>} : vector<2x32xbf16>, vector<32x128xbf16>, vector<2x128xf32> -> vector<2x128xf32>
    %66 = arith.addf %63, %65 : vector<2x128xf32>
    %67 = arith.mulf %66, %21 : vector<2x128xf32>
    %68 = math.tanh %67 : vector<2x128xf32>
    %69 = arith.mulf %68, %21 : vector<2x128xf32>
    %70 = arith.addf %69, %23 : vector<2x128xf32>
    %71 = vector.extract_strided_slice %70 {offsets = [0, 0], sizes = [2, 32], strides = [1, 1]} : vector<2x128xf32> to vector<2x32xf32>
    %72 = vector.extract_strided_slice %70 {offsets = [0, 32], sizes = [2, 32], strides = [1, 1]} : vector<2x128xf32> to vector<2x32xf32>
    %73 = vector.extract_strided_slice %70 {offsets = [0, 64], sizes = [2, 32], strides = [1, 1]} : vector<2x128xf32> to vector<2x32xf32>
    %74 = vector.extract_strided_slice %70 {offsets = [0, 96], sizes = [2, 32], strides = [1, 1]} : vector<2x128xf32> to vector<2x32xf32>
    %75 = arith.mulf %72, %42 : vector<2x32xf32>
    %76 = arith.mulf %71, %73 : vector<2x32xf32>
    %77 = arith.addf %75, %76 : vector<2x32xf32>
    %78 = math.tanh %77 : vector<2x32xf32>
    %79 = arith.mulf %74, %78 : vector<2x32xf32>
    %80 = tpu.concatenate %79, %61 in 1 : vector<2x32xf32>, vector<2x32xf32> -> vector<2x64xf32>
    %81 = arith.truncf %80 : vector<2x64xf32> to vector<2x64xbf16>
    %cst_16 = arith.constant dense<0.000000e+00> : vector<2x128xf32>
    %82 = tpu.matmul %81, %3, %cst_16 {dimension_numbers = #tpu.dot_dimension_numbers<[1], [0], [0], [1], [0, 0, 1, 1], [], []>} : vector<2x64xbf16>, vector<64x128xbf16>, vector<2x128xf32> -> vector<2x128xf32>
    %83 = arith.addf %82, %25 : vector<2x128xf32>
    %84 = arith.mulf %83, %21 : vector<2x128xf32>
    %85 = math.tanh %84 : vector<2x128xf32>
    %86 = arith.mulf %85, %21 : vector<2x128xf32>
    %87 = arith.addf %86, %23 : vector<2x128xf32>
    %88 = vector.extract_strided_slice %87 {offsets = [0, 0], sizes = [2, 32], strides = [1, 1]} : vector<2x128xf32> to vector<2x32xf32>
    %89 = vector.extract_strided_slice %87 {offsets = [0, 32], sizes = [2, 32], strides = [1, 1]} : vector<2x128xf32> to vector<2x32xf32>
    %90 = vector.extract_strided_slice %87 {offsets = [0, 64], sizes = [2, 32], strides = [1, 1]} : vector<2x128xf32> to vector<2x32xf32>
    %91 = vector.extract_strided_slice %87 {offsets = [0, 96], sizes = [2, 32], strides = [1, 1]} : vector<2x128xf32> to vector<2x32xf32>
    %92 = arith.mulf %89, %59 : vector<2x32xf32>
    %93 = arith.mulf %88, %90 : vector<2x32xf32>
    %94 = arith.addf %92, %93 : vector<2x32xf32>
    %95 = math.tanh %94 : vector<2x32xf32>
    %96 = arith.mulf %91, %95 : vector<2x32xf32>
    %c2 = arith.constant 2 : index
    %c0_17 = arith.constant 0 : index
    %c0_18 = arith.constant 0 : index
    %97 = vector.load %arg0[%c2, %c0_17, %c0_18] : memref<8x2x128xf32, #tpu.memory_space<vmem>>, vector<1x2x128xf32>
    %98 = vector.shape_cast %97 : vector<1x2x128xf32> to vector<2x128xf32>
    %99 = arith.truncf %79 : vector<2x32xf32> to vector<2x32xbf16>
    %cst_19 = arith.constant dense<0.000000e+00> : vector<2x128xf32>
    %100 = tpu.matmul %99, %1, %cst_19 {dimension_numbers = #tpu.dot_dimension_numbers<[1], [0], [0], [1], [0, 0, 1, 1], [], []>} : vector<2x32xbf16>, vector<32x128xbf16>, vector<2x128xf32> -> vector<2x128xf32>
    %101 = arith.addf %98, %100 : vector<2x128xf32>
    %102 = arith.mulf %101, %21 : vector<2x128xf32>
    %103 = math.tanh %102 : vector<2x128xf32>
    %104 = arith.mulf %103, %21 : vector<2x128xf32>
    %105 = arith.addf %104, %23 : vector<2x128xf32>
    %106 = vector.extract_strided_slice %105 {offsets = [0, 0], sizes = [2, 32], strides = [1, 1]} : vector<2x128xf32> to vector<2x32xf32>
    %107 = vector.extract_strided_slice %105 {offsets = [0, 32], sizes = [2, 32], strides = [1, 1]} : vector<2x128xf32> to vector<2x32xf32>
    %108 = vector.extract_strided_slice %105 {offsets = [0, 64], sizes = [2, 32], strides = [1, 1]} : vector<2x128xf32> to vector<2x32xf32>
    %109 = vector.extract_strided_slice %105 {offsets = [0, 96], sizes = [2, 32], strides = [1, 1]} : vector<2x128xf32> to vector<2x32xf32>
    %110 = arith.mulf %107, %77 : vector<2x32xf32>
    %111 = arith.mulf %106, %108 : vector<2x32xf32>
    %112 = arith.addf %110, %111 : vector<2x32xf32>
    %113 = math.tanh %112 : vector<2x32xf32>
    %114 = arith.mulf %109, %113 : vector<2x32xf32>
    %115 = tpu.concatenate %114, %96 in 1 : vector<2x32xf32>, vector<2x32xf32> -> vector<2x64xf32>
    %116 = arith.truncf %115 : vector<2x64xf32> to vector<2x64xbf16>
    %cst_20 = arith.constant dense<0.000000e+00> : vector<2x128xf32>
    %117 = tpu.matmul %116, %3, %cst_20 {dimension_numbers = #tpu.dot_dimension_numbers<[1], [0], [0], [1], [0, 0, 1, 1], [], []>} : vector<2x64xbf16>, vector<64x128xbf16>, vector<2x128xf32> -> vector<2x128xf32>
    %118 = arith.addf %117, %25 : vector<2x128xf32>
    %119 = arith.mulf %118, %21 : vector<2x128xf32>
    %120 = math.tanh %119 : vector<2x128xf32>
    %121 = arith.mulf %120, %21 : vector<2x128xf32>
    %122 = arith.addf %121, %23 : vector<2x128xf32>
    %123 = vector.extract_strided_slice %122 {offsets = [0, 0], sizes = [2, 32], strides = [1, 1]} : vector<2x128xf32> to vector<2x32xf32>
    %124 = vector.extract_strided_slice %122 {offsets = [0, 32], sizes = [2, 32], strides = [1, 1]} : vector<2x128xf32> to vector<2x32xf32>
    %125 = vector.extract_strided_slice %122 {offsets = [0, 64], sizes = [2, 32], strides = [1, 1]} : vector<2x128xf32> to vector<2x32xf32>
    %126 = vector.extract_strided_slice %122 {offsets = [0, 96], sizes = [2, 32], strides = [1, 1]} : vector<2x128xf32> to vector<2x32xf32>
    %127 = arith.mulf %124, %94 : vector<2x32xf32>
    %128 = arith.mulf %123, %125 : vector<2x32xf32>
    %129 = arith.addf %127, %128 : vector<2x32xf32>
    %130 = math.tanh %129 : vector<2x32xf32>
    %131 = arith.mulf %126, %130 : vector<2x32xf32>
    %c3 = arith.constant 3 : index
    %c0_21 = arith.constant 0 : index
    %c0_22 = arith.constant 0 : index
    %132 = vector.load %arg0[%c3, %c0_21, %c0_22] : memref<8x2x128xf32, #tpu.memory_space<vmem>>, vector<1x2x128xf32>
    %133 = vector.shape_cast %132 : vector<1x2x128xf32> to vector<2x128xf32>
    %134 = arith.truncf %114 : vector<2x32xf32> to vector<2x32xbf16>
    %cst_23 = arith.constant dense<0.000000e+00> : vector<2x128xf32>
    %135 = tpu.matmul %134, %1, %cst_23 {dimension_numbers = #tpu.dot_dimension_numbers<[1], [0], [0], [1], [0, 0, 1, 1], [], []>} : vector<2x32xbf16>, vector<32x128xbf16>, vector<2x128xf32> -> vector<2x128xf32>
    %136 = arith.addf %133, %135 : vector<2x128xf32>
    %137 = arith.mulf %136, %21 : vector<2x128xf32>
    %138 = math.tanh %137 : vector<2x128xf32>
    %139 = arith.mulf %138, %21 : vector<2x128xf32>
    %140 = arith.addf %139, %23 : vector<2x128xf32>
    %141 = vector.extract_strided_slice %140 {offsets = [0, 0], sizes = [2, 32], strides = [1, 1]} : vector<2x128xf32> to vector<2x32xf32>
    %142 = vector.extract_strided_slice %140 {offsets = [0, 32], sizes = [2, 32], strides = [1, 1]} : vector<2x128xf32> to vector<2x32xf32>
    %143 = vector.extract_strided_slice %140 {offsets = [0, 64], sizes = [2, 32], strides = [1, 1]} : vector<2x128xf32> to vector<2x32xf32>
    %144 = vector.extract_strided_slice %140 {offsets = [0, 96], sizes = [2, 32], strides = [1, 1]} : vector<2x128xf32> to vector<2x32xf32>
    %145 = arith.mulf %142, %112 : vector<2x32xf32>
    %146 = arith.mulf %141, %143 : vector<2x32xf32>
    %147 = arith.addf %145, %146 : vector<2x32xf32>
    %148 = math.tanh %147 : vector<2x32xf32>
    %149 = arith.mulf %144, %148 : vector<2x32xf32>
    %150 = tpu.concatenate %149, %131 in 1 : vector<2x32xf32>, vector<2x32xf32> -> vector<2x64xf32>
    %151 = arith.truncf %150 : vector<2x64xf32> to vector<2x64xbf16>
    %cst_24 = arith.constant dense<0.000000e+00> : vector<2x128xf32>
    %152 = tpu.matmul %151, %3, %cst_24 {dimension_numbers = #tpu.dot_dimension_numbers<[1], [0], [0], [1], [0, 0, 1, 1], [], []>} : vector<2x64xbf16>, vector<64x128xbf16>, vector<2x128xf32> -> vector<2x128xf32>
    %153 = arith.addf %152, %25 : vector<2x128xf32>
    %154 = arith.mulf %153, %21 : vector<2x128xf32>
    %155 = math.tanh %154 : vector<2x128xf32>
    %156 = arith.mulf %155, %21 : vector<2x128xf32>
    %157 = arith.addf %156, %23 : vector<2x128xf32>
    %158 = vector.extract_strided_slice %157 {offsets = [0, 0], sizes = [2, 32], strides = [1, 1]} : vector<2x128xf32> to vector<2x32xf32>
    %159 = vector.extract_strided_slice %157 {offsets = [0, 32], sizes = [2, 32], strides = [1, 1]} : vector<2x128xf32> to vector<2x32xf32>
    %160 = vector.extract_strided_slice %157 {offsets = [0, 64], sizes = [2, 32], strides = [1, 1]} : vector<2x128xf32> to vector<2x32xf32>
    %161 = vector.extract_strided_slice %157 {offsets = [0, 96], sizes = [2, 32], strides = [1, 1]} : vector<2x128xf32> to vector<2x32xf32>
    %162 = arith.mulf %159, %129 : vector<2x32xf32>
    %163 = arith.mulf %158, %160 : vector<2x32xf32>
    %164 = arith.addf %162, %163 : vector<2x32xf32>
    %165 = math.tanh %164 : vector<2x32xf32>
    %166 = arith.mulf %161, %165 : vector<2x32xf32>
    %c4 = arith.constant 4 : index
    %c0_25 = arith.constant 0 : index
    %c0_26 = arith.constant 0 : index
    %167 = vector.load %arg0[%c4, %c0_25, %c0_26] : memref<8x2x128xf32, #tpu.memory_space<vmem>>, vector<1x2x128xf32>
    %168 = vector.shape_cast %167 : vector<1x2x128xf32> to vector<2x128xf32>
    %169 = arith.truncf %149 : vector<2x32xf32> to vector<2x32xbf16>
    %cst_27 = arith.constant dense<0.000000e+00> : vector<2x128xf32>
    %170 = tpu.matmul %169, %1, %cst_27 {dimension_numbers = #tpu.dot_dimension_numbers<[1], [0], [0], [1], [0, 0, 1, 1], [], []>} : vector<2x32xbf16>, vector<32x128xbf16>, vector<2x128xf32> -> vector<2x128xf32>
    %171 = arith.addf %168, %170 : vector<2x128xf32>
    %172 = arith.mulf %171, %21 : vector<2x128xf32>
    %173 = math.tanh %172 : vector<2x128xf32>
    %174 = arith.mulf %173, %21 : vector<2x128xf32>
    %175 = arith.addf %174, %23 : vector<2x128xf32>
    %176 = vector.extract_strided_slice %175 {offsets = [0, 0], sizes = [2, 32], strides = [1, 1]} : vector<2x128xf32> to vector<2x32xf32>
    %177 = vector.extract_strided_slice %175 {offsets = [0, 32], sizes = [2, 32], strides = [1, 1]} : vector<2x128xf32> to vector<2x32xf32>
    %178 = vector.extract_strided_slice %175 {offsets = [0, 64], sizes = [2, 32], strides = [1, 1]} : vector<2x128xf32> to vector<2x32xf32>
    %179 = vector.extract_strided_slice %175 {offsets = [0, 96], sizes = [2, 32], strides = [1, 1]} : vector<2x128xf32> to vector<2x32xf32>
    %180 = arith.mulf %177, %147 : vector<2x32xf32>
    %181 = arith.mulf %176, %178 : vector<2x32xf32>
    %182 = arith.addf %180, %181 : vector<2x32xf32>
    %183 = math.tanh %182 : vector<2x32xf32>
    %184 = arith.mulf %179, %183 : vector<2x32xf32>
    %185 = tpu.concatenate %184, %166 in 1 : vector<2x32xf32>, vector<2x32xf32> -> vector<2x64xf32>
    %186 = arith.truncf %185 : vector<2x64xf32> to vector<2x64xbf16>
    %cst_28 = arith.constant dense<0.000000e+00> : vector<2x128xf32>
    %187 = tpu.matmul %186, %3, %cst_28 {dimension_numbers = #tpu.dot_dimension_numbers<[1], [0], [0], [1], [0, 0, 1, 1], [], []>} : vector<2x64xbf16>, vector<64x128xbf16>, vector<2x128xf32> -> vector<2x128xf32>
    %188 = arith.addf %187, %25 : vector<2x128xf32>
    %189 = arith.mulf %188, %21 : vector<2x128xf32>
    %190 = math.tanh %189 : vector<2x128xf32>
    %191 = arith.mulf %190, %21 : vector<2x128xf32>
    %192 = arith.addf %191, %23 : vector<2x128xf32>
    %193 = vector.extract_strided_slice %192 {offsets = [0, 0], sizes = [2, 32], strides = [1, 1]} : vector<2x128xf32> to vector<2x32xf32>
    %194 = vector.extract_strided_slice %192 {offsets = [0, 32], sizes = [2, 32], strides = [1, 1]} : vector<2x128xf32> to vector<2x32xf32>
    %195 = vector.extract_strided_slice %192 {offsets = [0, 64], sizes = [2, 32], strides = [1, 1]} : vector<2x128xf32> to vector<2x32xf32>
    %196 = vector.extract_strided_slice %192 {offsets = [0, 96], sizes = [2, 32], strides = [1, 1]} : vector<2x128xf32> to vector<2x32xf32>
    %197 = arith.mulf %194, %164 : vector<2x32xf32>
    %198 = arith.mulf %193, %195 : vector<2x32xf32>
    %199 = arith.addf %197, %198 : vector<2x32xf32>
    %200 = math.tanh %199 : vector<2x32xf32>
    %201 = arith.mulf %196, %200 : vector<2x32xf32>
    %c5 = arith.constant 5 : index
    %c0_29 = arith.constant 0 : index
    %c0_30 = arith.constant 0 : index
    %202 = vector.load %arg0[%c5, %c0_29, %c0_30] : memref<8x2x128xf32, #tpu.memory_space<vmem>>, vector<1x2x128xf32>
    %203 = vector.shape_cast %202 : vector<1x2x128xf32> to vector<2x128xf32>
    %204 = arith.truncf %184 : vector<2x32xf32> to vector<2x32xbf16>
    %cst_31 = arith.constant dense<0.000000e+00> : vector<2x128xf32>
    %205 = tpu.matmul %204, %1, %cst_31 {dimension_numbers = #tpu.dot_dimension_numbers<[1], [0], [0], [1], [0, 0, 1, 1], [], []>} : vector<2x32xbf16>, vector<32x128xbf16>, vector<2x128xf32> -> vector<2x128xf32>
    %206 = arith.addf %203, %205 : vector<2x128xf32>
    %207 = arith.mulf %206, %21 : vector<2x128xf32>
    %208 = math.tanh %207 : vector<2x128xf32>
    %209 = arith.mulf %208, %21 : vector<2x128xf32>
    %210 = arith.addf %209, %23 : vector<2x128xf32>
    %211 = vector.extract_strided_slice %210 {offsets = [0, 0], sizes = [2, 32], strides = [1, 1]} : vector<2x128xf32> to vector<2x32xf32>
    %212 = vector.extract_strided_slice %210 {offsets = [0, 32], sizes = [2, 32], strides = [1, 1]} : vector<2x128xf32> to vector<2x32xf32>
    %213 = vector.extract_strided_slice %210 {offsets = [0, 64], sizes = [2, 32], strides = [1, 1]} : vector<2x128xf32> to vector<2x32xf32>
    %214 = vector.extract_strided_slice %210 {offsets = [0, 96], sizes = [2, 32], strides = [1, 1]} : vector<2x128xf32> to vector<2x32xf32>
    %215 = arith.mulf %212, %182 : vector<2x32xf32>
    %216 = arith.mulf %211, %213 : vector<2x32xf32>
    %217 = arith.addf %215, %216 : vector<2x32xf32>
    %218 = math.tanh %217 : vector<2x32xf32>
    %219 = arith.mulf %214, %218 : vector<2x32xf32>
    %220 = tpu.concatenate %219, %201 in 1 : vector<2x32xf32>, vector<2x32xf32> -> vector<2x64xf32>
    %221 = arith.truncf %220 : vector<2x64xf32> to vector<2x64xbf16>
    %cst_32 = arith.constant dense<0.000000e+00> : vector<2x128xf32>
    %222 = tpu.matmul %221, %3, %cst_32 {dimension_numbers = #tpu.dot_dimension_numbers<[1], [0], [0], [1], [0, 0, 1, 1], [], []>} : vector<2x64xbf16>, vector<64x128xbf16>, vector<2x128xf32> -> vector<2x128xf32>
    %223 = arith.addf %222, %25 : vector<2x128xf32>
    %224 = arith.mulf %223, %21 : vector<2x128xf32>
    %225 = math.tanh %224 : vector<2x128xf32>
    %226 = arith.mulf %225, %21 : vector<2x128xf32>
    %227 = arith.addf %226, %23 : vector<2x128xf32>
    %228 = vector.extract_strided_slice %227 {offsets = [0, 0], sizes = [2, 32], strides = [1, 1]} : vector<2x128xf32> to vector<2x32xf32>
    %229 = vector.extract_strided_slice %227 {offsets = [0, 32], sizes = [2, 32], strides = [1, 1]} : vector<2x128xf32> to vector<2x32xf32>
    %230 = vector.extract_strided_slice %227 {offsets = [0, 64], sizes = [2, 32], strides = [1, 1]} : vector<2x128xf32> to vector<2x32xf32>
    %231 = vector.extract_strided_slice %227 {offsets = [0, 96], sizes = [2, 32], strides = [1, 1]} : vector<2x128xf32> to vector<2x32xf32>
    %232 = arith.mulf %229, %199 : vector<2x32xf32>
    %233 = arith.mulf %228, %230 : vector<2x32xf32>
    %234 = arith.addf %232, %233 : vector<2x32xf32>
    %235 = math.tanh %234 : vector<2x32xf32>
    %236 = arith.mulf %231, %235 : vector<2x32xf32>
    %c6 = arith.constant 6 : index
    %c0_33 = arith.constant 0 : index
    %c0_34 = arith.constant 0 : index
    %237 = vector.load %arg0[%c6, %c0_33, %c0_34] : memref<8x2x128xf32, #tpu.memory_space<vmem>>, vector<1x2x128xf32>
    %238 = vector.shape_cast %237 : vector<1x2x128xf32> to vector<2x128xf32>
    %239 = arith.truncf %219 : vector<2x32xf32> to vector<2x32xbf16>
    %cst_35 = arith.constant dense<0.000000e+00> : vector<2x128xf32>
    %240 = tpu.matmul %239, %1, %cst_35 {dimension_numbers = #tpu.dot_dimension_numbers<[1], [0], [0], [1], [0, 0, 1, 1], [], []>} : vector<2x32xbf16>, vector<32x128xbf16>, vector<2x128xf32> -> vector<2x128xf32>
    %241 = arith.addf %238, %240 : vector<2x128xf32>
    %242 = arith.mulf %241, %21 : vector<2x128xf32>
    %243 = math.tanh %242 : vector<2x128xf32>
    %244 = arith.mulf %243, %21 : vector<2x128xf32>
    %245 = arith.addf %244, %23 : vector<2x128xf32>
    %246 = vector.extract_strided_slice %245 {offsets = [0, 0], sizes = [2, 32], strides = [1, 1]} : vector<2x128xf32> to vector<2x32xf32>
    %247 = vector.extract_strided_slice %245 {offsets = [0, 32], sizes = [2, 32], strides = [1, 1]} : vector<2x128xf32> to vector<2x32xf32>
    %248 = vector.extract_strided_slice %245 {offsets = [0, 64], sizes = [2, 32], strides = [1, 1]} : vector<2x128xf32> to vector<2x32xf32>
    %249 = vector.extract_strided_slice %245 {offsets = [0, 96], sizes = [2, 32], strides = [1, 1]} : vector<2x128xf32> to vector<2x32xf32>
    %250 = arith.mulf %247, %217 : vector<2x32xf32>
    %251 = arith.mulf %246, %248 : vector<2x32xf32>
    %252 = arith.addf %250, %251 : vector<2x32xf32>
    %253 = math.tanh %252 : vector<2x32xf32>
    %254 = arith.mulf %249, %253 : vector<2x32xf32>
    %255 = tpu.concatenate %254, %236 in 1 : vector<2x32xf32>, vector<2x32xf32> -> vector<2x64xf32>
    %256 = arith.truncf %255 : vector<2x64xf32> to vector<2x64xbf16>
    %cst_36 = arith.constant dense<0.000000e+00> : vector<2x128xf32>
    %257 = tpu.matmul %256, %3, %cst_36 {dimension_numbers = #tpu.dot_dimension_numbers<[1], [0], [0], [1], [0, 0, 1, 1], [], []>} : vector<2x64xbf16>, vector<64x128xbf16>, vector<2x128xf32> -> vector<2x128xf32>
    %258 = arith.addf %257, %25 : vector<2x128xf32>
    %259 = arith.mulf %258, %21 : vector<2x128xf32>
    %260 = math.tanh %259 : vector<2x128xf32>
    %261 = arith.mulf %260, %21 : vector<2x128xf32>
    %262 = arith.addf %261, %23 : vector<2x128xf32>
    %263 = vector.extract_strided_slice %262 {offsets = [0, 0], sizes = [2, 32], strides = [1, 1]} : vector<2x128xf32> to vector<2x32xf32>
    %264 = vector.extract_strided_slice %262 {offsets = [0, 32], sizes = [2, 32], strides = [1, 1]} : vector<2x128xf32> to vector<2x32xf32>
    %265 = vector.extract_strided_slice %262 {offsets = [0, 64], sizes = [2, 32], strides = [1, 1]} : vector<2x128xf32> to vector<2x32xf32>
    %266 = vector.extract_strided_slice %262 {offsets = [0, 96], sizes = [2, 32], strides = [1, 1]} : vector<2x128xf32> to vector<2x32xf32>
    %267 = arith.mulf %264, %234 : vector<2x32xf32>
    %268 = arith.mulf %263, %265 : vector<2x32xf32>
    %269 = arith.addf %267, %268 : vector<2x32xf32>
    %270 = math.tanh %269 : vector<2x32xf32>
    %271 = arith.mulf %266, %270 : vector<2x32xf32>
    %c7 = arith.constant 7 : index
    %c0_37 = arith.constant 0 : index
    %c0_38 = arith.constant 0 : index
    %272 = vector.load %arg0[%c7, %c0_37, %c0_38] : memref<8x2x128xf32, #tpu.memory_space<vmem>>, vector<1x2x128xf32>
    %273 = vector.shape_cast %272 : vector<1x2x128xf32> to vector<2x128xf32>
    %274 = arith.truncf %254 : vector<2x32xf32> to vector<2x32xbf16>
    %cst_39 = arith.constant dense<0.000000e+00> : vector<2x128xf32>
    %275 = tpu.matmul %274, %1, %cst_39 {dimension_numbers = #tpu.dot_dimension_numbers<[1], [0], [0], [1], [0, 0, 1, 1], [], []>} : vector<2x32xbf16>, vector<32x128xbf16>, vector<2x128xf32> -> vector<2x128xf32>
    %276 = arith.addf %273, %275 : vector<2x128xf32>
    %277 = arith.mulf %276, %21 : vector<2x128xf32>
    %278 = math.tanh %277 : vector<2x128xf32>
    %279 = arith.mulf %278, %21 : vector<2x128xf32>
    %280 = arith.addf %279, %23 : vector<2x128xf32>
    %281 = vector.extract_strided_slice %280 {offsets = [0, 0], sizes = [2, 32], strides = [1, 1]} : vector<2x128xf32> to vector<2x32xf32>
    %282 = vector.extract_strided_slice %280 {offsets = [0, 32], sizes = [2, 32], strides = [1, 1]} : vector<2x128xf32> to vector<2x32xf32>
    %283 = vector.extract_strided_slice %280 {offsets = [0, 64], sizes = [2, 32], strides = [1, 1]} : vector<2x128xf32> to vector<2x32xf32>
    %284 = vector.extract_strided_slice %280 {offsets = [0, 96], sizes = [2, 32], strides = [1, 1]} : vector<2x128xf32> to vector<2x32xf32>
    %285 = arith.mulf %282, %252 : vector<2x32xf32>
    %286 = arith.mulf %281, %283 : vector<2x32xf32>
    %287 = arith.addf %285, %286 : vector<2x32xf32>
    %288 = math.tanh %287 : vector<2x32xf32>
    %289 = arith.mulf %284, %288 : vector<2x32xf32>
    %290 = tpu.concatenate %289, %271 in 1 : vector<2x32xf32>, vector<2x32xf32> -> vector<2x64xf32>
    %291 = arith.truncf %290 : vector<2x64xf32> to vector<2x64xbf16>
    %cst_40 = arith.constant dense<0.000000e+00> : vector<2x128xf32>
    %292 = tpu.matmul %291, %3, %cst_40 {dimension_numbers = #tpu.dot_dimension_numbers<[1], [0], [0], [1], [0, 0, 1, 1], [], []>} : vector<2x64xbf16>, vector<64x128xbf16>, vector<2x128xf32> -> vector<2x128xf32>
    %293 = arith.addf %292, %25 : vector<2x128xf32>
    %294 = arith.mulf %293, %21 : vector<2x128xf32>
    %295 = math.tanh %294 : vector<2x128xf32>
    %296 = arith.mulf %295, %21 : vector<2x128xf32>
    %297 = arith.addf %296, %23 : vector<2x128xf32>
    %298 = vector.extract_strided_slice %297 {offsets = [0, 0], sizes = [2, 32], strides = [1, 1]} : vector<2x128xf32> to vector<2x32xf32>
    %299 = vector.extract_strided_slice %297 {offsets = [0, 32], sizes = [2, 32], strides = [1, 1]} : vector<2x128xf32> to vector<2x32xf32>
    %300 = vector.extract_strided_slice %297 {offsets = [0, 64], sizes = [2, 32], strides = [1, 1]} : vector<2x128xf32> to vector<2x32xf32>
    %301 = vector.extract_strided_slice %297 {offsets = [0, 96], sizes = [2, 32], strides = [1, 1]} : vector<2x128xf32> to vector<2x32xf32>
    %302 = arith.mulf %299, %269 : vector<2x32xf32>
    %303 = arith.mulf %298, %300 : vector<2x32xf32>
    %304 = arith.addf %302, %303 : vector<2x32xf32>
    %305 = math.tanh %304 : vector<2x32xf32>
    %306 = arith.mulf %301, %305 : vector<2x32xf32>
    %cst_41 = arith.constant dense<0.000000e+00> : vector<2x128xf32>
    %307 = tpu.matmul %306, %4, %cst_41 {dimension_numbers = #tpu.dot_dimension_numbers<[1], [0], [0], [1], [0, 0, 1, 1], [], []>} : vector<2x32xf32>, vector<32x128xf32>, vector<2x128xf32> -> vector<2x128xf32>
    %308 = vector.broadcast %7 : vector<1x128xf32> to vector<2x128xf32>
    %309 = arith.addf %307, %308 : vector<2x128xf32>
    %c0_42 = arith.constant 0 : index
    %c0_43 = arith.constant 0 : index
    %310 = vector.load %arg2[%c0_42, %c0_43] : memref<2x128xf32, #tpu.memory_space<vmem>>, vector<2x128xf32>
    tpu.vector_store %arg2[%c0_42, %c0_43], %309 {strides = array<i32>} : memref<2x128xf32, #tpu.memory_space<vmem>>, vector<2x128xf32>,
    return
  }
}

</mosaic_0001>

<bundles_post_ra>
// kernel: timeseries_testnet_forward.1
= control target key start
LH: loop header
LB: loop body
LE: loop exit
PB: predicated region body
PF: predicated region fallthrough
CT: control target
= control target key end

     0   :  { %v1659_v3 = vmov 0.0   ;;  %vm1660_vm0 = vmmov 0   ;;  %s2122_s0 = inlined_call_operand.vmem [shape: f32[8,2,128], index: 0, kind: input, shape index: {}]   ;;  %s2123_s1 = inlined_call_operand.vmem [shape: f32[136,128], index: 1, kind: input, shape index: {}]   ;;  %s2124_s2 = inlined_call_operand.hbm [shape: f32[2,128], index: 2, kind: output, shape index: {}]  }
   0x1   :  { %v13_v0 = vld [vmem:[%s2123_s1] sm:$0xff]  ;;  %v14_v1 = vld [vmem:[%s2123_s1 + $0x8] sm:$0xff]  ;;  %v15_v2 = vld [vmem:[%s2123_s1 + $0x10] sm:$0xff]  ;;  %1386 = vmatprep.subr.bf16.mxu1 %v1659_v3  ;;  %1390 = vmatprep.mubr.msk.bf16.mxu1 %vm1660_vm0, %v1659_v3 }
   0x2   :  { %v1692_v4 = vpack.c.bf16 %v14_v1, %v13_v0  ;;  %v16_v5 = vld [vmem:[%s2123_s1 + $0x18] sm:$0xff] }
   0x3   :  { %7 = vsyncpa [#allocation3], 0  ;;  %1406 = vmatprep.subr.bf16.mxu0 %v1659_v3  ;;  %1410 = vmatprep.mubr.msk.bf16.mxu0 %vm1660_vm0, %v1659_v3  ;;  %v1703_v6 = vpack.c.bf16 %v16_v5, %v15_v2  ;;  %v1661_v7 = vmov 0   ;;  %v36_v8 = vlaneseq  ;;  %v47_v10 = vld [vmem:[%s2122_s0] sm:$0x3]  ;;  %v1662_v11 = vmov 0.5  }
   0x4   :  { %1387 = vmatpush3.bf16.msra.mxu1 %v1692_v4  ;;  %1407 = vmatpush3.bf16.msra.mxu0 %v1692_v4  ;;  %s1663_s19 = smov 64   ;;  %s1664_s20 = smov 32   ;;  %v19_v28 = vld [vmem:[%s2123_s1 + $0x20] sm:$0xff]  ;;  %v20_v29 = vld [vmem:[%s2123_s1 + $0x28] sm:$0xff]  ;;  %v21_v30 = vld [vmem:[%s2123_s1 + $0x30] sm:$0xff]  ;;  %vm48_vm4 = vcmask 261120  }
   0x5   :  { %1388 = vmatprep.subr.bf16.mxu1 %v1659_v3  ;;  %1408 = vmatprep.subr.bf16.mxu0 %v1659_v3  ;;  %v37_v9 = vand.u32 127, %v36_v8  ;;  %v1739_v31 = vpack.c.bf16 %v20_v29, %v19_v28  ;;  %v22_v32 = vld [vmem:[%s2123_s1 + $0x38] sm:$0xff]  ;;  %v23_v34 = vld [vmem:[%s2123_s1 + $0x40] sm:$0xff]  ;;  %v24_v35 = vld [vmem:[%s2123_s1 + $0x48] sm:$0xff]  ;;  %vm120_vm5 = vcmask 523264   ;;  %v1793_v48 = vshrl.u32 %v36_v8, 7 }
   0x6   :  { %v1745_v33 = vpack.c.bf16 %v22_v32, %v21_v30  ;;  %v1755_v36 = vpack.c.bf16 %v24_v35, %v23_v34  ;;  %v25_v38 = vld [vmem:[%s2123_s1 + $0x50] sm:$0xff]  ;;  %v26_v39 = vld [vmem:[%s2123_s1 + $0x58] sm:$0xff]  ;;  %v1799_v50 = vld [vmem:[%s2123_s1 + $0x80] sm:$0xff]  ;;  %s1666_s6 = smov [#allocation2]  }
   0x7   :  { %vm38_vm1 = vcmp.ge.s32.totalorder %v37_v9, 64  ;;  %vm39_vm2 = vcmp.lt.s32.totalorder %v37_v9, 96  ;;  %v1767_v40 = vpack.c.bf16 %v26_v39, %v25_v38  ;;  %v45_v49 = vsub.s32 0, %v1793_v48  ;;  %v1295_v51 = vld [vmem:[%s2122_s0 + $0x2] sm:$0x3] }
   0x8   :  { %1389 = vmatpush3.bf16.msra.mxu1 %v1703_v6  ;;  %1409 = vmatpush3.bf16.msra.mxu0 %v1703_v6  ;;  %vm40_vm3 = vmand %vm38_vm1, %vm39_vm2 }
   0x9   :  { %1394 = vmatprep.subr.bf16.mxu1 %v1659_v3  ;;  %1414 = vmatprep.subr.bf16.mxu0 %v1659_v3  ;;  %v1718_v12 = vsel %vm40_vm3, 1.0, %v1662_v11  ;;  %v1721_v20 = vsel %vm40_vm3, 0.0, %v1662_v11  ;;  %v1805_v52 = vrot.slane %v1799_v50, %v45_v49 }
   0xb   :  { %1391 = vmatmul.mubr.bf16.vlgmr.msra.gmra.mrb[0].mxu1 %v1661_v7 }
   0xc   :  { %1402 = vmatprep.mubr.msk.bf16.mxu1 %vm1660_vm0, %v1659_v3  ;;  %1395 = vmatpush3.bf16.msra.mxu1 %v1739_v31 }
   0xd   :  { %1396 = vmatprep.subr.bf16.mxu1 %v1659_v3 }
  0x10   :  { %1397 = vmatpush3.bf16.msra.mxu1 %v1745_v33 }
  0x11   :  { %1398 = vmatprep.subr.bf16.mxu1 %v1659_v3 }
  0x14   :  { %1399 = vmatpush3.bf16.msra.mxu1 %v1755_v36 }
  0x15   :  { %1400 = vmatprep.subr.bf16.mxu1 %v1659_v3 }
  0x18   :  { %1401 = vmatpush3.bf16.msra.mxu1 %v1767_v40 }
  0x19   :  { %1426 = vmatprep.subr.bf16.mxu1 %v1659_v3 }
  0xde   :  { %v86_v13 = vpop.f32.mrb[0].mxu1 }
  0xdf   :  { %v92_v14 = vadd.f32 %v86_v13, %v47_v10  ;;  %v1392_v15 = vpop.f32.mrb[1].mxu1 }
  0xe0   :  { %v89_v16 = vpop.f32.mrb[2].mxu1 }
  0xe1   :  { %v93_v17 = vmul.f32 %v92_v14, %v1718_v12  ;;  %v1393_v18 = vpop.f32.mrb[3].mxu1 }
  0xe3   :  { %1571 = vtanh.f32 %v93_v17 }
  0xed   :  { %v1572_v19 = vpop.eup %1571 }
  0xee   :  { %v95_v21 = vmul.f32 %v1572_v19, %v1718_v12 }
  0xf0   :  { %v96_v22 = vadd.f32 %v95_v21, %v1721_v20 }
  0xf2   :  { %99 = vrot.lane.b32.xlu0 %v96_v22, %s1663_s19  ;;  %v97_v25 = vmul.f32 0.0, %v96_v22 }
 0x164   :  { %v100_v23 = vpop.permute.xlu0 %99 }
 0x165   :  { %v102_v24 = vmul.f32 %v100_v23, %v96_v22 }
 0x167   :  { %104 = vrot.lane.b32.xlu0 %v102_v24, %s1664_s20 }
 0x1d9   :  { %v105_v26 = vpop.permute.xlu0 %104 }
 0x1da   :  { %v1727_v27 = vadd.f32 %v105_v26, %v97_v25 }
 0x1dc   :  { %1573 = vtanh.f32 %v1727_v27 }
 0x1e6   :  { %v1574_v37 = vpop.eup %1573 }
 0x1e7   :  { %110 = vrot.lane.b32.xlu1 %v1574_v37, %s1663_s19  ;;  %v1298_v37 = vld [vmem:[%s2122_s0 + $0x4] sm:$0x3] }
 0x259   :  { %v111_v41 = vpop.permute.xlu1 %110 }
 0x25a   :  { %v113_v42 = vmul.f32 %v111_v41, %v96_v22 }
 0x25c   :  { %v187_v43 = vpack.c.bf16 %v113_v42, %v113_v42  ;;  %115 = vrot.lane.b32.xlu1 %v113_v42, %s1664_s20 }
 0x25e   :  { %189 = vrot.lane.b32.xlu0 %v187_v43, %s1664_s20 }
 0x2ce   :  { %v116_v44 = vpop.permute.xlu1 %115 }
 0x2cf   :  { %v118_v45 = vsel %vm48_vm4, %v116_v44, 0.0 }
 0x2d0   :  { %v119_v46 = vpack.c.bf16 %v118_v45, %v118_v45  ;;  %v190_v47 = vpop.permute.xlu0 %189 }
 0x2d1   :  { %1411 = vmatmul.mubr.msk.bf16.vlgmr.msra.gmra.mrb[0].mxu0 %vm48_vm4, %v190_v47 }
 0x2d2   :  { %1403 = vmatmul.mubr.msk.bf16.vlgmr.msra.gmra.mrb[4].mxu1 %vm120_vm5, %v119_v46  ;;  %1415 = vmatpush3.bf16.msra.mxu0 %v1739_v31 }
 0x2d3   :  { %1416 = vmatprep.subr.bf16.mxu0 %v1659_v3  ;;  %1427 = vmatpush3.bf16.msra.mxu1 %v1692_v4 }
 0x2d4   :  { %1428 = vmatprep.subr.bf16.mxu1 %v1659_v3  ;;  %1422 = vmatprep.mubr.msk.bf16.mxu0 %vm1660_vm0, %v1659_v3 }
 0x2d5   :  { %1430 = vmatprep.mubr.msk.bf16.mxu1 %vm1660_vm0, %v1659_v3 }
 0x2d6   :  { %1417 = vmatpush3.bf16.msra.mxu0 %v1745_v33 }
 0x2d7   :  { %1418 = vmatprep.subr.bf16.mxu0 %v1659_v3  ;;  %1429 = vmatpush3.bf16.msra.mxu1 %v1703_v6 }
 0x2d8   :  { %1434 = vmatprep.subr.bf16.mxu1 %v1659_v3 }
 0x2da   :  { %1419 = vmatpush3.bf16.msra.mxu0 %v1755_v36 }
 0x2db   :  { %1420 = vmatprep.subr.bf16.mxu0 %v1659_v3 }
 0x2de   :  { %1421 = vmatpush3.bf16.msra.mxu0 %v1767_v40 }
 0x2df   :  { %1446 = vmatprep.subr.bf16.mxu0 %v1659_v3 }
 0x3a4   :  { %v228_v53 = vpop.f32.mrb[0].mxu0 }
 0x3a5   :  { %v234_v54 = vadd.f32 %v1295_v51, %v228_v53  ;;  %v158_v55 = vpop.f32.mrb[4].mxu1  ;;  %v1412_v56 = vpop.f32.mrb[1].mxu0 }
 0x3a6   :  { %v159_v57 = vadd.f32 %v158_v55, %v1805_v52  ;;  %v1404_v58 = vpop.f32.mrb[5].mxu1  ;;  %v231_v59 = vpop.f32.mrb[2].mxu0 }
 0x3a7   :  { %v235_v60 = vmul.f32 %v234_v54, %v1718_v12  ;;  %v161_v61 = vpop.f32.mrb[6].mxu1  ;;  %v1413_v62 = vpop.f32.mrb[3].mxu0 }
 0x3a8   :  { %v164_v63 = vmul.f32 %v159_v57, %v1718_v12  ;;  %v1405_v0 = vpop.f32.mrb[7].mxu1 }
 0x3a9   :  { %1575 = vtanh.f32 %v235_v60 }
 0x3aa   :  { %1577 = vtanh.f32 %v164_v63 }
 0x3b3   :  { %v1576_v1 = vpop.eup %1575 }
 0x3b4   :  { %v1578_v2 = vpop.eup %1577  ;;  %v237_v5 = vmul.f32 %v1576_v1, %v1718_v12 }
 0x3b5   :  { %v166_v7 = vmul.f32 %v1578_v2, %v1718_v12 }
 0x3b6   :  { %v238_v8 = vadd.f32 %v237_v5, %v1721_v20 }
 0x3b7   :  { %v167_v9 = vadd.f32 %v166_v7, %v1721_v20 }
 0x3b8   :  { %241 = vrot.lane.b32.xlu0 %v238_v8, %s1663_s19  ;;  %v239_v15 = vmul.f32 %v238_v8, %v1727_v27 }
 0x3b9   :  { %170 = vrot.lane.b32.xlu1 %v167_v9, %s1663_s19  ;;  %v168_v17 = vmul.f32 0.0, %v167_v9 }
 0x42a   :  { %v242_v10 = vpop.permute.xlu0 %241 }
 0x42b   :  { %v244_v11 = vmul.f32 %v242_v10, %v238_v8  ;;  %v171_v13 = vpop.permute.xlu1 %170 }
 0x42c   :  { %v173_v14 = vmul.f32 %v171_v13, %v167_v9 }
 0x42d   :  { %246 = vrot.lane.b32.xlu0 %v244_v11, %s1664_s20 }
 0x42e   :  { %175 = vrot.lane.b32.xlu1 %v173_v14, %s1664_s20 }
 0x49f   :  { %v247_v16 = vpop.permute.xlu0 %246 }
 0x4a0   :  { %v1819_v18 = vadd.f32 %v247_v16, %v239_v15  ;;  %v176_v19 = vpop.permute.xlu1 %175 }
 0x4a1   :  { %v1821_v21 = vadd.f32 %v176_v19, %v168_v17 }
 0x4a2   :  { %1579 = vtanh.f32 %v1819_v18 }
 0x4a3   :  { %1581 = vtanh.f32 %v1821_v21 }
 0x4ac   :  { %v1580_v22 = vpop.eup %1579 }
 0x4ad   :  { %v1582_v23 = vpop.eup %1581  ;;  %252 = vrot.lane.b32.xlu0 %v1580_v22, %s1663_s19 }
 0x4ae   :  { %181 = vrot.lane.b32.xlu1 %v1582_v23, %s1663_s19  ;;  %v1301_v23 = vld [vmem:[%s2122_s0 + $0x6] sm:$0x3] }
 0x51f   :  { %v253_v24 = vpop.permute.xlu0 %252 }
 0x520   :  { %v255_v25 = vmul.f32 %v253_v24, %v238_v8  ;;  %v182_v26 = vpop.permute.xlu1 %181 }
 0x521   :  { %v184_v27 = vmul.f32 %v182_v26, %v167_v9 }
 0x522   :  { %257 = vrot.lane.b32.xlu1 %v255_v25, %s1664_s20  ;;  %v332_v28 = vpack.c.bf16 %v255_v25, %v255_v25 }
 0x523   :  { %261 = vrot.lane.b32.xlu0 %v184_v27, %s1663_s19 }
 0x526   :  { %334 = vrot.lane.b32.xlu1 %v332_v28, %s1664_s20 }
 0x594   :  { %v258_v29 = vpop.permute.xlu1 %257 }
 0x595   :  { %v262_v30 = vpop.permute.xlu0 %261 }
 0x596   :  { %v264_v32 = vsel %vm48_vm4, %v258_v29, %v262_v30 }
 0x597   :  { %v265_v34 = vpack.c.bf16 %v264_v32, %v264_v32 }
 0x598   :  { %v335_v35 = vpop.permute.xlu1 %334 }
 0x599   :  { %1423 = vmatmul.mubr.msk.bf16.vlgmr.msra.gmra.mrb[4].mxu0 %vm120_vm5, %v265_v34  ;;  %1431 = vmatmul.mubr.msk.bf16.vlgmr.msra.gmra.mrb[8].mxu1 %vm48_vm4, %v335_v35 }
 0x59a   :  { %1435 = vmatpush3.bf16.msra.mxu1 %v1739_v31  ;;  %1447 = vmatpush3.bf16.msra.mxu0 %v1692_v4 }
 0x59b   :  { %1436 = vmatprep.subr.bf16.mxu1 %v1659_v3  ;;  %1448 = vmatprep.subr.bf16.mxu0 %v1659_v3 }
 0x59c   :  { %1442 = vmatprep.mubr.msk.bf16.mxu1 %vm1660_vm0, %v1659_v3  ;;  %1450 = vmatprep.mubr.msk.bf16.mxu0 %vm1660_vm0, %v1659_v3 }
 0x59e   :  { %1437 = vmatpush3.bf16.msra.mxu1 %v1745_v33  ;;  %1449 = vmatpush3.bf16.msra.mxu0 %v1703_v6 }
 0x59f   :  { %1438 = vmatprep.subr.bf16.mxu1 %v1659_v3  ;;  %1454 = vmatprep.subr.bf16.mxu0 %v1659_v3 }
 0x5a2   :  { %1439 = vmatpush3.bf16.msra.mxu1 %v1755_v36 }
 0x5a3   :  { %1440 = vmatprep.subr.bf16.mxu1 %v1659_v3 }
 0x5a6   :  { %1441 = vmatpush3.bf16.msra.mxu1 %v1767_v40 }
 0x5a7   :  { %1466 = vmatprep.subr.bf16.mxu1 %v1659_v3 }
 0x66c   :  { %v303_v38 = vpop.f32.mrb[4].mxu0  ;;  %v373_v39 = vpop.f32.mrb[8].mxu1 }
 0x66d   :  { %v304_v41 = vadd.f32 %v303_v38, %v1805_v52  ;;  %v379_v42 = vadd.f32 %v1298_v37, %v373_v39  ;;  %v1424_v43 = vpop.f32.mrb[5].mxu0  ;;  %v1432_v44 = vpop.f32.mrb[9].mxu1 }
 0x66e   :  { %v306_v45 = vpop.f32.mrb[6].mxu0  ;;  %v376_v46 = vpop.f32.mrb[10].mxu1 }
 0x66f   :  { %v309_v47 = vmul.f32 %v304_v41, %v1718_v12  ;;  %v380_v49 = vmul.f32 %v379_v42, %v1718_v12  ;;  %v1425_v51 = vpop.f32.mrb[7].mxu0  ;;  %v1433_v53 = vpop.f32.mrb[11].mxu1 }
 0x671   :  { %1583 = vtanh.f32 %v309_v47 }
 0x672   :  { %1585 = vtanh.f32 %v380_v49 }
 0x67b   :  { %v1584_v54 = vpop.eup %1583 }
 0x67c   :  { %v1586_v55 = vpop.eup %1585  ;;  %v311_v56 = vmul.f32 %v1584_v54, %v1718_v12 }
 0x67d   :  { %v382_v57 = vmul.f32 %v1586_v55, %v1718_v12 }
 0x67e   :  { %v312_v58 = vadd.f32 %v311_v56, %v1721_v20 }
 0x67f   :  { %v383_v59 = vadd.f32 %v382_v57, %v1721_v20 }
 0x680   :  { %315 = vrot.lane.b32.xlu0 %v312_v58, %s1663_s19  ;;  %v313_v0 = vmul.f32 %v312_v58, %v1821_v21 }
 0x681   :  { %386 = vrot.lane.b32.xlu1 %v383_v59, %s1663_s19  ;;  %v384_v2 = vmul.f32 %v383_v59, %v1819_v18 }
 0x6f2   :  { %v316_v60 = vpop.permute.xlu0 %315 }
 0x6f3   :  { %v318_v61 = vmul.f32 %v316_v60, %v312_v58  ;;  %v387_v62 = vpop.permute.xlu1 %386 }
 0x6f4   :  { %v389_v63 = vmul.f32 %v387_v62, %v383_v59 }
 0x6f5   :  { %320 = vrot.lane.b32.xlu0 %v318_v61, %s1664_s20 }
 0x6f6   :  { %391 = vrot.lane.b32.xlu1 %v389_v63, %s1664_s20 }
 0x767   :  { %v321_v1 = vpop.permute.xlu0 %320 }
 0x768   :  { %v1865_v5 = vadd.f32 %v321_v1, %v313_v0  ;;  %v392_v7 = vpop.permute.xlu1 %391 }
 0x769   :  { %v1867_v8 = vadd.f32 %v392_v7, %v384_v2 }
 0x76a   :  { %1587 = vtanh.f32 %v1865_v5 }
 0x76b   :  { %1589 = vtanh.f32 %v1867_v8 }
 0x774   :  { %v1588_v9 = vpop.eup %1587 }
 0x775   :  { %v1590_v10 = vpop.eup %1589  ;;  %326 = vrot.lane.b32.xlu0 %v1588_v9, %s1663_s19 }
 0x776   :  { %397 = vrot.lane.b32.xlu1 %v1590_v10, %s1663_s19  ;;  %v1304_v10 = vld [vmem:[%s2122_s0 + $0x8] sm:$0x3] }
 0x7e7   :  { %v327_v11 = vpop.permute.xlu0 %326 }
 0x7e8   :  { %v329_v13 = vmul.f32 %v327_v11, %v312_v58  ;;  %v398_v14 = vpop.permute.xlu1 %397 }
 0x7e9   :  { %v400_v15 = vmul.f32 %v398_v14, %v383_v59 }
 0x7ea   :  { %406 = vrot.lane.b32.xlu1 %v329_v13, %s1663_s19 }
 0x7eb   :  { %402 = vrot.lane.b32.xlu0 %v400_v15, %s1664_s20  ;;  %v477_v16 = vpack.c.bf16 %v400_v15, %v400_v15 }
 0x7ef   :  { %479 = vrot.lane.b32.xlu0 %v477_v16, %s1664_s20 }
 0x85c   :  { %v407_v17 = vpop.permute.xlu1 %406 }
 0x85d   :  { %v403_v18 = vpop.permute.xlu0 %402 }
 0x85e   :  { %v409_v19 = vsel %vm48_vm4, %v403_v18, %v407_v17 }
 0x85f   :  { %v410_v21 = vpack.c.bf16 %v409_v19, %v409_v19 }
 0x861   :  { %v480_v22 = vpop.permute.xlu0 %479  ;;  %1443 = vmatmul.mubr.msk.bf16.vlgmr.msra.gmra.mrb[12].mxu1 %vm120_vm5, %v410_v21 }
 0x862   :  { %1451 = vmatmul.mubr.msk.bf16.vlgmr.msra.gmra.mrb[8].mxu0 %vm48_vm4, %v480_v22  ;;  %1467 = vmatpush3.bf16.msra.mxu1 %v1692_v4 }
 0x863   :  { %1455 = vmatpush3.bf16.msra.mxu0 %v1739_v31  ;;  %1468 = vmatprep.subr.bf16.mxu1 %v1659_v3 }
 0x864   :  { %1456 = vmatprep.subr.bf16.mxu0 %v1659_v3  ;;  %1462 = vmatprep.mubr.msk.bf16.mxu0 %vm1660_vm0, %v1659_v3 }
 0x865   :  { %1470 = vmatprep.mubr.msk.bf16.mxu1 %vm1660_vm0, %v1659_v3 }
 0x866   :  { %1469 = vmatpush3.bf16.msra.mxu1 %v1703_v6 }
 0x867   :  { %1457 = vmatpush3.bf16.msra.mxu0 %v1745_v33  ;;  %1474 = vmatprep.subr.bf16.mxu1 %v1659_v3 }
 0x868   :  { %1458 = vmatprep.subr.bf16.mxu0 %v1659_v3 }
 0x86b   :  { %1459 = vmatpush3.bf16.msra.mxu0 %v1755_v36 }
 0x86c   :  { %1460 = vmatprep.subr.bf16.mxu0 %v1659_v3 }
 0x86f   :  { %1461 = vmatpush3.bf16.msra.mxu0 %v1767_v40 }
 0x870   :  { %1486 = vmatprep.subr.bf16.mxu0 %v1659_v3 }
 0x934   :  { %v448_v24 = vpop.f32.mrb[12].mxu1 }
 0x935   :  { %v449_v25 = vadd.f32 %v448_v24, %v1805_v52  ;;  %v1444_v26 = vpop.f32.mrb[13].mxu1  ;;  %v518_v27 = vpop.f32.mrb[8].mxu0 }
 0x936   :  { %v524_v28 = vadd.f32 %v1301_v23, %v518_v27  ;;  %v451_v29 = vpop.f32.mrb[14].mxu1  ;;  %v1452_v30 = vpop.f32.mrb[9].mxu0 }
 0x937   :  { %v454_v32 = vmul.f32 %v449_v25, %v1718_v12  ;;  %v1445_v34 = vpop.f32.mrb[15].mxu1  ;;  %v521_v35 = vpop.f32.mrb[10].mxu0 }
 0x938   :  { %v525_v37 = vmul.f32 %v524_v28, %v1718_v12  ;;  %v1453_v38 = vpop.f32.mrb[11].mxu0 }
 0x939   :  { %1591 = vtanh.f32 %v454_v32 }
 0x93a   :  { %1593 = vtanh.f32 %v525_v37 }
 0x943   :  { %v1592_v39 = vpop.eup %1591 }
 0x944   :  { %v1594_v41 = vpop.eup %1593  ;;  %v456_v42 = vmul.f32 %v1592_v39, %v1718_v12 }
 0x945   :  { %v527_v43 = vmul.f32 %v1594_v41, %v1718_v12 }
 0x946   :  { %v457_v44 = vadd.f32 %v456_v42, %v1721_v20 }
 0x947   :  { %v528_v45 = vadd.f32 %v527_v43, %v1721_v20 }
 0x948   :  { %460 = vrot.lane.b32.xlu1 %v457_v44, %s1663_s19  ;;  %v458_v53 = vmul.f32 %v457_v44, %v1865_v5 }
 0x949   :  { %531 = vrot.lane.b32.xlu0 %v528_v45, %s1663_s19  ;;  %v529_v55 = vmul.f32 %v528_v45, %v1867_v8 }
 0x9ba   :  { %v461_v46 = vpop.permute.xlu1 %460 }
 0x9bb   :  { %v463_v47 = vmul.f32 %v461_v46, %v457_v44  ;;  %v532_v49 = vpop.permute.xlu0 %531 }
 0x9bc   :  { %v534_v51 = vmul.f32 %v532_v49, %v528_v45 }
 0x9bd   :  { %465 = vrot.lane.b32.xlu1 %v463_v47, %s1664_s20 }
 0x9be   :  { %536 = vrot.lane.b32.xlu0 %v534_v51, %s1664_s20 }
 0xa2f   :  { %v466_v54 = vpop.permute.xlu1 %465 }
 0xa30   :  { %v1911_v56 = vadd.f32 %v466_v54, %v458_v53  ;;  %v537_v57 = vpop.permute.xlu0 %536 }
 0xa31   :  { %v1913_v58 = vadd.f32 %v537_v57, %v529_v55 }
 0xa32   :  { %1595 = vtanh.f32 %v1911_v56 }
 0xa33   :  { %1597 = vtanh.f32 %v1913_v58 }
 0xa3c   :  { %v1596_v59 = vpop.eup %1595 }
 0xa3d   :  { %v1598_v60 = vpop.eup %1597  ;;  %471 = vrot.lane.b32.xlu1 %v1596_v59, %s1663_s19 }
 0xa3e   :  { %542 = vrot.lane.b32.xlu0 %v1598_v60, %s1663_s19  ;;  %v1307_v60 = vld [vmem:[%s2122_s0 + $0xa] sm:$0x3] }
 0xaaf   :  { %v472_v61 = vpop.permute.xlu1 %471 }
 0xab0   :  { %v474_v62 = vmul.f32 %v472_v61, %v457_v44  ;;  %v543_v63 = vpop.permute.xlu0 %542 }
 0xab1   :  { %v545_v0 = vmul.f32 %v543_v63, %v528_v45 }
 0xab2   :  { %551 = vrot.lane.b32.xlu0 %v474_v62, %s1663_s19 }
 0xab3   :  { %547 = vrot.lane.b32.xlu1 %v545_v0, %s1664_s20  ;;  %v622_v1 = vpack.c.bf16 %v545_v0, %v545_v0 }
 0xab7   :  { %624 = vrot.lane.b32.xlu1 %v622_v1, %s1664_s20 }
 0xb24   :  { %v552_v2 = vpop.permute.xlu0 %551 }
 0xb25   :  { %v548_v5 = vpop.permute.xlu1 %547 }
 0xb26   :  { %v554_v7 = vsel %vm48_vm4, %v548_v5, %v552_v2 }
 0xb27   :  { %v555_v8 = vpack.c.bf16 %v554_v7, %v554_v7 }
 0xb29   :  { %1463 = vmatmul.mubr.msk.bf16.vlgmr.msra.gmra.mrb[12].mxu0 %vm120_vm5, %v555_v8  ;;  %v625_v9 = vpop.permute.xlu1 %624 }
 0xb2a   :  { %1471 = vmatmul.mubr.msk.bf16.vlgmr.msra.gmra.mrb[16].mxu1 %vm48_vm4, %v625_v9  ;;  %1487 = vmatpush3.bf16.msra.mxu0 %v1692_v4 }
 0xb2b   :  { %1475 = vmatpush3.bf16.msra.mxu1 %v1739_v31  ;;  %1488 = vmatprep.subr.bf16.mxu0 %v1659_v3 }
 0xb2c   :  { %1476 = vmatprep.subr.bf16.mxu1 %v1659_v3  ;;  %1482 = vmatprep.mubr.msk.bf16.mxu1 %vm1660_vm0, %v1659_v3 }
 0xb2d   :  { %1490 = vmatprep.mubr.msk.bf16.mxu0 %vm1660_vm0, %v1659_v3 }
 0xb2e   :  { %1489 = vmatpush3.bf16.msra.mxu0 %v1703_v6 }
 0xb2f   :  { %1477 = vmatpush3.bf16.msra.mxu1 %v1745_v33  ;;  %1494 = vmatprep.subr.bf16.mxu0 %v1659_v3 }
 0xb30   :  { %1478 = vmatprep.subr.bf16.mxu1 %v1659_v3 }
 0xb33   :  { %1479 = vmatpush3.bf16.msra.mxu1 %v1755_v36 }
 0xb34   :  { %1480 = vmatprep.subr.bf16.mxu1 %v1659_v3 }
 0xb37   :  { %1481 = vmatpush3.bf16.msra.mxu1 %v1767_v40 }
 0xb38   :  { %1506 = vmatprep.subr.bf16.mxu1 %v1659_v3 }
 0xbfc   :  { %v593_v11 = vpop.f32.mrb[12].mxu0 }
 0xbfd   :  { %v594_v13 = vadd.f32 %v593_v11, %v1805_v52  ;;  %v1464_v14 = vpop.f32.mrb[13].mxu0  ;;  %v663_v15 = vpop.f32.mrb[16].mxu1 }
 0xbfe   :  { %v669_v16 = vadd.f32 %v1304_v10, %v663_v15  ;;  %v596_v17 = vpop.f32.mrb[14].mxu0  ;;  %v1472_v18 = vpop.f32.mrb[17].mxu1 }
 0xbff   :  { %v599_v19 = vmul.f32 %v594_v13, %v1718_v12  ;;  %v1465_v21 = vpop.f32.mrb[15].mxu0  ;;  %v666_v22 = vpop.f32.mrb[18].mxu1 }
 0xc00   :  { %v670_v23 = vmul.f32 %v669_v16, %v1718_v12  ;;  %v1473_v24 = vpop.f32.mrb[19].mxu1 }
 0xc01   :  { %1599 = vtanh.f32 %v599_v19 }
 0xc02   :  { %1601 = vtanh.f32 %v670_v23 }
 0xc0b   :  { %v1600_v25 = vpop.eup %1599 }
 0xc0c   :  { %v1602_v26 = vpop.eup %1601  ;;  %v601_v27 = vmul.f32 %v1600_v25, %v1718_v12 }
 0xc0d   :  { %v672_v28 = vmul.f32 %v1602_v26, %v1718_v12 }
 0xc0e   :  { %v602_v29 = vadd.f32 %v601_v27, %v1721_v20 }
 0xc0f   :  { %v673_v30 = vadd.f32 %v672_v28, %v1721_v20 }
 0xc10   :  { %605 = vrot.lane.b32.xlu0 %v602_v29, %s1663_s19  ;;  %v603_v38 = vmul.f32 %v602_v29, %v1911_v56 }
 0xc11   :  { %676 = vrot.lane.b32.xlu1 %v673_v30, %s1663_s19  ;;  %v674_v41 = vmul.f32 %v673_v30, %v1913_v58 }
 0xc82   :  { %v606_v32 = vpop.permute.xlu0 %605 }
 0xc83   :  { %v608_v34 = vmul.f32 %v606_v32, %v602_v29  ;;  %v677_v35 = vpop.permute.xlu1 %676 }
 0xc84   :  { %v679_v37 = vmul.f32 %v677_v35, %v673_v30 }
 0xc85   :  { %610 = vrot.lane.b32.xlu0 %v608_v34, %s1664_s20 }
 0xc86   :  { %681 = vrot.lane.b32.xlu1 %v679_v37, %s1664_s20 }
 0xcf7   :  { %v611_v39 = vpop.permute.xlu0 %610 }
 0xcf8   :  { %v1957_v42 = vadd.f32 %v611_v39, %v603_v38  ;;  %v682_v43 = vpop.permute.xlu1 %681 }
 0xcf9   :  { %v1959_v44 = vadd.f32 %v682_v43, %v674_v41 }
 0xcfa   :  { %1603 = vtanh.f32 %v1957_v42 }
 0xcfb   :  { %1605 = vtanh.f32 %v1959_v44 }
 0xd04   :  { %v1604_v45 = vpop.eup %1603 }
 0xd05   :  { %v1606_v46 = vpop.eup %1605  ;;  %616 = vrot.lane.b32.xlu0 %v1604_v45, %s1663_s19 }
 0xd06   :  { %687 = vrot.lane.b32.xlu1 %v1606_v46, %s1663_s19 }
 0xd77   :  { %v617_v47 = vpop.permute.xlu0 %616 }
 0xd78   :  { %v619_v49 = vmul.f32 %v617_v47, %v602_v29  ;;  %v688_v51 = vpop.permute.xlu1 %687 }
 0xd79   :  { %v690_v53 = vmul.f32 %v688_v51, %v673_v30 }
 0xd7a   :  { %696 = vrot.lane.b32.xlu1 %v619_v49, %s1663_s19 }
 0xd7b   :  { %692 = vrot.lane.b32.xlu0 %v690_v53, %s1664_s20  ;;  %v767_v54 = vpack.c.bf16 %v690_v53, %v690_v53 }
 0xd7f   :  { %769 = vrot.lane.b32.xlu0 %v767_v54, %s1664_s20 }
 0xdec   :  { %v697_v55 = vpop.permute.xlu1 %696 }
 0xded   :  { %v693_v56 = vpop.permute.xlu0 %692 }
 0xdee   :  { %v699_v57 = vsel %vm48_vm4, %v693_v56, %v697_v55 }
 0xdef   :  { %v700_v58 = vpack.c.bf16 %v699_v57, %v699_v57 }
 0xdf1   :  { %v770_v59 = vpop.permute.xlu0 %769  ;;  %1483 = vmatmul.mubr.msk.bf16.vlgmr.msra.gmra.mrb[20].mxu1 %vm120_vm5, %v700_v58 }
 0xdf2   :  { %1491 = vmatmul.mubr.msk.bf16.vlgmr.msra.gmra.mrb[16].mxu0 %vm48_vm4, %v770_v59  ;;  %1507 = vmatpush3.bf16.msra.mxu1 %v1692_v4 }
 0xdf3   :  { %1495 = vmatpush3.bf16.msra.mxu0 %v1739_v31  ;;  %1508 = vmatprep.subr.bf16.mxu1 %v1659_v3 }
 0xdf4   :  { %1496 = vmatprep.subr.bf16.mxu0 %v1659_v3  ;;  %1502 = vmatprep.mubr.msk.bf16.mxu0 %vm1660_vm0, %v1659_v3 }
 0xdf5   :  { %1510 = vmatprep.mubr.msk.bf16.mxu1 %vm1660_vm0, %v1659_v3 }
 0xdf6   :  { %1509 = vmatpush3.bf16.msra.mxu1 %v1703_v6 }
 0xdf7   :  { %1497 = vmatpush3.bf16.msra.mxu0 %v1745_v33  ;;  %1514 = vmatprep.subr.bf16.mxu1 %v1659_v3 }
 0xdf8   :  { %1498 = vmatprep.subr.bf16.mxu0 %v1659_v3 }
 0xdfb   :  { %1499 = vmatpush3.bf16.msra.mxu0 %v1755_v36 }
 0xdfc   :  { %1500 = vmatprep.subr.bf16.mxu0 %v1659_v3 }
 0xdff   :  { %1501 = vmatpush3.bf16.msra.mxu0 %v1767_v40 }
 0xe00   :  { %1526 = vmatprep.subr.bf16.mxu0 %v1659_v3 }
 0xec4   :  { %v738_v61 = vpop.f32.mrb[20].mxu1 }
 0xec5   :  { %v739_v62 = vadd.f32 %v738_v61, %v1805_v52  ;;  %v1484_v63 = vpop.f32.mrb[21].mxu1  ;;  %v808_v0 = vpop.f32.mrb[16].mxu0 }
 0xec6   :  { %v814_v1 = vadd.f32 %v1307_v60, %v808_v0  ;;  %v741_v2 = vpop.f32.mrb[22].mxu1  ;;  %v1492_v5 = vpop.f32.mrb[17].mxu0 }
 0xec7   :  { %v744_v7 = vmul.f32 %v739_v62, %v1718_v12  ;;  %v1485_v8 = vpop.f32.mrb[23].mxu1  ;;  %v811_v9 = vpop.f32.mrb[18].mxu0 }
 0xec8   :  { %v815_v10 = vmul.f32 %v814_v1, %v1718_v12  ;;  %v1493_v11 = vpop.f32.mrb[19].mxu0 }
 0xec9   :  { %1607 = vtanh.f32 %v744_v7 }
 0xeca   :  { %1609 = vtanh.f32 %v815_v10 }
 0xed3   :  { %v1608_v13 = vpop.eup %1607 }
 0xed4   :  { %v1610_v14 = vpop.eup %1609  ;;  %v746_v15 = vmul.f32 %v1608_v13, %v1718_v12 }
 0xed5   :  { %v817_v16 = vmul.f32 %v1610_v14, %v1718_v12 }
 0xed6   :  { %v747_v17 = vadd.f32 %v746_v15, %v1721_v20 }
 0xed7   :  { %v818_v18 = vadd.f32 %v817_v16, %v1721_v20 }
 0xed8   :  { %750 = vrot.lane.b32.xlu1 %v747_v17, %s1663_s19  ;;  %v748_v24 = vmul.f32 %v747_v17, %v1957_v42 }
 0xed9   :  { %821 = vrot.lane.b32.xlu0 %v818_v18, %s1663_s19  ;;  %v819_v26 = vmul.f32 %v818_v18, %v1959_v44 }
 0xf4a   :  { %v751_v19 = vpop.permute.xlu1 %750 }
 0xf4b   :  { %v753_v21 = vmul.f32 %v751_v19, %v747_v17  ;;  %v822_v22 = vpop.permute.xlu0 %821 }
 0xf4c   :  { %v824_v23 = vmul.f32 %v822_v22, %v818_v18 }
 0xf4d   :  { %755 = vrot.lane.b32.xlu1 %v753_v21, %s1664_s20 }
 0xf4e   :  { %826 = vrot.lane.b32.xlu0 %v824_v23, %s1664_s20 }
 0xfbf   :  { %v756_v25 = vpop.permute.xlu1 %755 }
 0xfc0   :  { %v2003_v27 = vadd.f32 %v756_v25, %v748_v24  ;;  %v827_v28 = vpop.permute.xlu0 %826 }
 0xfc1   :  { %v2005_v29 = vadd.f32 %v827_v28, %v819_v26 }
 0xfc2   :  { %1611 = vtanh.f32 %v2003_v27 }
 0xfc3   :  { %1613 = vtanh.f32 %v2005_v29 }
 0xfcc   :  { %v1612_v30 = vpop.eup %1611 }
 0xfcd   :  { %v1614_v32 = vpop.eup %1613  ;;  %761 = vrot.lane.b32.xlu1 %v1612_v30, %s1663_s19 }
 0xfce   :  { %832 = vrot.lane.b32.xlu0 %v1614_v32, %s1663_s19 }
0x103f   :  { %v762_v34 = vpop.permute.xlu1 %761 }
0x1040   :  { %v764_v35 = vmul.f32 %v762_v34, %v747_v17  ;;  %v833_v37 = vpop.permute.xlu0 %832 }
0x1041   :  { %v835_v38 = vmul.f32 %v833_v37, %v818_v18 }
0x1042   :  { %841 = vrot.lane.b32.xlu0 %v764_v35, %s1663_s19 }
0x1043   :  { %837 = vrot.lane.b32.xlu1 %v835_v38, %s1664_s20  ;;  %v912_v39 = vpack.c.bf16 %v835_v38, %v835_v38 }
0x1047   :  { %914 = vrot.lane.b32.xlu1 %v912_v39, %s1664_s20 }
0x10b4   :  { %v842_v41 = vpop.permute.xlu0 %841 }
0x10b5   :  { %v838_v42 = vpop.permute.xlu1 %837 }
0x10b6   :  { %v844_v43 = vsel %vm48_vm4, %v838_v42, %v842_v41 }
0x10b7   :  { %v845_v44 = vpack.c.bf16 %v844_v43, %v844_v43 }
0x10b9   :  { %1503 = vmatmul.mubr.msk.bf16.vlgmr.msra.gmra.mrb[20].mxu0 %vm120_vm5, %v845_v44  ;;  %v915_v45 = vpop.permute.xlu1 %914 }
0x10ba   :  { %1511 = vmatmul.mubr.msk.bf16.vlgmr.msra.gmra.mrb[24].mxu1 %vm48_vm4, %v915_v45  ;;  %1527 = vmatpush3.bf16.msra.mxu0 %v1692_v4  ;;  %v1310_v4 = vld [vmem:[%s2122_s0 + $0xc] sm:$0x3] }
0x10bb   :  { %1515 = vmatpush3.bf16.msra.mxu1 %v1739_v31  ;;  %1528 = vmatprep.subr.bf16.mxu0 %v1659_v3 }
0x10bc   :  { %1516 = vmatprep.subr.bf16.mxu1 %v1659_v3  ;;  %1522 = vmatprep.mubr.msk.bf16.mxu1 %vm1660_vm0, %v1659_v3 }
0x10bd   :  { %1530 = vmatprep.mubr.msk.bf16.mxu0 %vm1660_vm0, %v1659_v3 }
0x10be   :  { %1529 = vmatpush3.bf16.msra.mxu0 %v1703_v6 }
0x10bf   :  { %1517 = vmatpush3.bf16.msra.mxu1 %v1745_v33  ;;  %1534 = vmatprep.subr.bf16.mxu0 %v1659_v3 }
0x10c0   :  { %1518 = vmatprep.subr.bf16.mxu1 %v1659_v3 }
0x10c3   :  { %1519 = vmatpush3.bf16.msra.mxu1 %v1755_v36 }
0x10c4   :  { %1520 = vmatprep.subr.bf16.mxu1 %v1659_v3 }
0x10c7   :  { %1521 = vmatpush3.bf16.msra.mxu1 %v1767_v40 }
0x118c   :  { %v883_v46 = vpop.f32.mrb[20].mxu0 }
0x118d   :  { %v884_v47 = vadd.f32 %v883_v46, %v1805_v52  ;;  %v1504_v6 = vpop.f32.mrb[21].mxu0  ;;  %v953_v49 = vpop.f32.mrb[24].mxu1 }
0x118e   :  { %v959_v51 = vadd.f32 %v1310_v4, %v953_v49  ;;  %v886_v53 = vpop.f32.mrb[22].mxu0  ;;  %v1512_v54 = vpop.f32.mrb[25].mxu1 }
0x118f   :  { %v889_v55 = vmul.f32 %v884_v47, %v1718_v12  ;;  %v1505_v56 = vpop.f32.mrb[23].mxu0  ;;  %v956_v57 = vpop.f32.mrb[26].mxu1 }
0x1190   :  { %v960_v58 = vmul.f32 %v959_v51, %v1718_v12  ;;  %v1513_v59 = vpop.f32.mrb[27].mxu1 }
0x1191   :  { %1615 = vtanh.f32 %v889_v55 }
0x1192   :  { %1617 = vtanh.f32 %v960_v58 }
0x119b   :  { %v1616_v60 = vpop.eup %1615 }
0x119c   :  { %v1618_v61 = vpop.eup %1617  ;;  %v891_v62 = vmul.f32 %v1616_v60, %v1718_v12 }
0x119d   :  { %v962_v63 = vmul.f32 %v1618_v61, %v1718_v12 }
0x119e   :  { %v892_v0 = vadd.f32 %v891_v62, %v1721_v20 }
0x119f   :  { %v963_v1 = vadd.f32 %v962_v63, %v1721_v20 }
0x11a0   :  { %895 = vrot.lane.b32.xlu0 %v892_v0, %s1663_s19  ;;  %v893_v9 = vmul.f32 %v892_v0, %v2003_v27 }
0x11a1   :  { %966 = vrot.lane.b32.xlu1 %v963_v1, %s1663_s19  ;;  %v964_v11 = vmul.f32 %v963_v1, %v2005_v29  ;;  %v1313_v29 = vld [vmem:[%s2122_s0 + $0xe] sm:$0x3] }
0x1212   :  { %v896_v2 = vpop.permute.xlu0 %895 }
0x1213   :  { %v898_v5 = vmul.f32 %v896_v2, %v892_v0  ;;  %v967_v7 = vpop.permute.xlu1 %966 }
0x1214   :  { %v969_v8 = vmul.f32 %v967_v7, %v963_v1 }
0x1215   :  { %900 = vrot.lane.b32.xlu0 %v898_v5, %s1664_s20 }
0x1216   :  { %971 = vrot.lane.b32.xlu1 %v969_v8, %s1664_s20 }
0x1287   :  { %v901_v10 = vpop.permute.xlu0 %900 }
0x1288   :  { %v903_v13 = vadd.f32 %v901_v10, %v893_v9  ;;  %v972_v14 = vpop.permute.xlu1 %971 }
0x1289   :  { %v974_v15 = vadd.f32 %v972_v14, %v964_v11 }
0x128a   :  { %1619 = vtanh.f32 %v903_v13 }
0x128b   :  { %1621 = vtanh.f32 %v974_v15 }
0x1294   :  { %v1620_v16 = vpop.eup %1619 }
0x1295   :  { %v1622_v17 = vpop.eup %1621  ;;  %906 = vrot.lane.b32.xlu0 %v1620_v16, %s1663_s19 }
0x1296   :  { %977 = vrot.lane.b32.xlu1 %v1622_v17, %s1663_s19 }
0x1307   :  { %v907_v18 = vpop.permute.xlu0 %906 }
0x1308   :  { %v909_v19 = vmul.f32 %v907_v18, %v892_v0  ;;  %v978_v21 = vpop.permute.xlu1 %977 }
0x1309   :  { %v980_v22 = vmul.f32 %v978_v21, %v963_v1 }
0x130a   :  { %986 = vrot.lane.b32.xlu1 %v909_v19, %s1663_s19 }
0x130b   :  { %982 = vrot.lane.b32.xlu0 %v980_v22, %s1664_s20  ;;  %v1057_v23 = vpack.c.bf16 %v980_v22, %v980_v22  ;;  %v31_v22 = vld [vmem:[%s2123_s1 + $0x60] sm:$0xff] }
0x130f   :  { %1059 = vrot.lane.b32.xlu0 %v1057_v23, %s1664_s20  ;;  %v1665_v23 = vmov 0.0|0.0  }
0x1310   :  { %1557 = vmatprep.subr.bf16.mxu1 %v1665_v23 }
0x137c   :  { %v987_v24 = vpop.permute.xlu1 %986 }
0x137d   :  { %v983_v25 = vpop.permute.xlu0 %982 }
0x137e   :  { %v989_v26 = vsel %vm48_vm4, %v983_v25, %v987_v24  ;;  %v34_v25 = vld [vmem:[%s2123_s1 + $0x78] sm:$0xff] }
0x137f   :  { %v990_v27 = vpack.c.bf16 %v989_v26, %v989_v26 }
0x1381   :  { %v1060_v28 = vpop.permute.xlu0 %1059  ;;  %1523 = vmatmul.mubr.msk.bf16.vlgmr.msra.gmra.mrb[28].mxu1 %vm120_vm5, %v990_v27 }
0x1382   :  { %1531 = vmatmul.mubr.msk.bf16.vlgmr.msra.gmra.mrb[24].mxu0 %vm48_vm4, %v1060_v28  ;;  %1554 = vmatprep.mubr.msk.f32.mxu1 %vm1660_vm0, %v1659_v3 }
0x1383   :  { %1535 = vmatpush3.bf16.msra.mxu0 %v1739_v31  ;;  %1542 = vmatprep.mubr.msk.bf16.mxu0 %vm1660_vm0, %v1659_v3 }
0x1384   :  { %1536 = vmatprep.subr.bf16.mxu0 %v1659_v3 }
0x1387   :  { %1537 = vmatpush3.bf16.msra.mxu0 %v1745_v33 }
0x1388   :  { %1538 = vmatprep.subr.bf16.mxu0 %v1659_v3 }
0x138b   :  { %1539 = vmatpush3.bf16.msra.mxu0 %v1755_v36 }
0x138c   :  { %1540 = vmatprep.subr.bf16.mxu0 %v1659_v3 }
0x138f   :  { %1541 = vmatpush3.bf16.msra.mxu0 %v1767_v40 }
0x1454   :  { %v1028_v31 = vpop.f32.mrb[28].mxu1 }
0x1455   :  { %v1029_v30 = vadd.f32 %v1028_v31, %v1805_v52  ;;  %v1524_v32 = vpop.f32.mrb[29].mxu1  ;;  %v1098_v34 = vpop.f32.mrb[24].mxu0 }
0x1456   :  { %v1104_v35 = vadd.f32 %v1313_v29, %v1098_v34  ;;  %v1031_v37 = vpop.f32.mrb[30].mxu1  ;;  %v1532_v33 = vpop.f32.mrb[25].mxu0 }
0x1457   :  { %v1034_v38 = vmul.f32 %v1029_v30, %v1718_v12  ;;  %v1525_v39 = vpop.f32.mrb[31].mxu1  ;;  %v1101_v36 = vpop.f32.mrb[26].mxu0  ;;  %v1202_v30 = vsub.s32 1, %v1793_v48 }
0x1458   :  { %v1105_v3 = vmul.f32 %v1104_v35, %v1718_v12  ;;  %v1533_v41 = vpop.f32.mrb[27].mxu0 }
0x1459   :  { %1623 = vtanh.f32 %v1034_v38  ;;  %v1203_v32 = vrot.slane %v1799_v50, %v1202_v30 }
0x145a   :  { %1625 = vtanh.f32 %v1105_v3 }
0x1463   :  { %v1624_v40 = vpop.eup %1623 }
0x1464   :  { %v1626_v42 = vpop.eup %1625  ;;  %v1036_v43 = vmul.f32 %v1624_v40, %v1718_v12 }
0x1465   :  { %v1107_v44 = vmul.f32 %v1626_v42, %v1718_v12 }
0x1466   :  { %v1037_v45 = vadd.f32 %v1036_v43, %v1721_v20 }
0x1467   :  { %v1108_v4 = vadd.f32 %v1107_v44, %v1721_v20 }
0x1468   :  { %1040 = vrot.lane.b32.xlu1 %v1037_v45, %s1663_s19  ;;  %v1038_v51 = vmul.f32 %v1037_v45, %v903_v13 }
0x1469   :  { %1111 = vrot.lane.b32.xlu0 %v1108_v4, %s1663_s19  ;;  %v1109_v54 = vmul.f32 %v1108_v4, %v974_v15 }
0x14da   :  { %v1041_v46 = vpop.permute.xlu1 %1040 }
0x14db   :  { %v1043_v47 = vmul.f32 %v1041_v46, %v1037_v45  ;;  %v1112_v6 = vpop.permute.xlu0 %1111 }
0x14dc   :  { %v1114_v49 = vmul.f32 %v1112_v6, %v1108_v4 }
0x14dd   :  { %1045 = vrot.lane.b32.xlu1 %v1043_v47, %s1664_s20 }
0x14de   :  { %1116 = vrot.lane.b32.xlu0 %v1114_v49, %s1664_s20 }
0x154f   :  { %v1046_v53 = vpop.permute.xlu1 %1045 }
0x1550   :  { %v1048_v55 = vadd.f32 %v1046_v53, %v1038_v51  ;;  %v1117_v56 = vpop.permute.xlu0 %1116 }
0x1551   :  { %v1119_v57 = vadd.f32 %v1117_v56, %v1109_v54 }
0x1552   :  { %1627 = vtanh.f32 %v1048_v55 }
0x1553   :  { %1629 = vtanh.f32 %v1119_v57 }
0x155c   :  { %v1628_v58 = vpop.eup %1627 }
0x155d   :  { %v1630_v59 = vpop.eup %1629  ;;  %1051 = vrot.lane.b32.xlu1 %v1628_v58, %s1663_s19 }
0x155e   :  { %1122 = vrot.lane.b32.xlu0 %v1630_v59, %s1663_s19 }
0x15cf   :  { %v1052_v60 = vpop.permute.xlu1 %1051 }
0x15d0   :  { %v1054_v61 = vmul.f32 %v1052_v60, %v1037_v45  ;;  %v1123_v62 = vpop.permute.xlu0 %1122 }
0x15d1   :  { %v1125_v63 = vmul.f32 %v1123_v62, %v1108_v4 }
0x15d2   :  { %1131 = vrot.lane.b32.xlu0 %v1054_v61, %s1663_s19 }
0x15d3   :  { %1127 = vrot.lane.b32.xlu1 %v1125_v63, %s1664_s20 }
0x1644   :  { %v1132_v0 = vpop.permute.xlu0 %1131 }
0x1645   :  { %v1128_v1 = vpop.permute.xlu1 %1127 }
0x1646   :  { %v1134_v2 = vsel %vm48_vm4, %v1128_v1, %v1132_v0 }
0x1647   :  { %v1135_v5 = vpack.c.bf16 %v1134_v2, %v1134_v2 }
0x1649   :  { %1543 = vmatmul.mubr.msk.bf16.vlgmr.msra.gmra.mrb[28].mxu0 %vm120_vm5, %v1135_v5 }
0x171c   :  { %v1173_v7 = vpop.f32.mrb[28].mxu0 }
0x171d   :  { %v1174_v8 = vadd.f32 %v1173_v7, %v1805_v52  ;;  %v1544_v9 = vpop.f32.mrb[29].mxu0 }
0x171e   :  { %v1176_v10 = vpop.f32.mrb[30].mxu0 }
0x171f   :  { %v1179_v11 = vmul.f32 %v1174_v8, %v1718_v12  ;;  %v1545_v13 = vpop.f32.mrb[31].mxu0 }
0x1721   :  { %1631 = vtanh.f32 %v1179_v11 }
0x172b   :  { %v1632_v14 = vpop.eup %1631 }
0x172c   :  { %v1181_v15 = vmul.f32 %v1632_v14, %v1718_v12  ;;  %v32_v12 = vld [vmem:[%s2123_s1 + $0x68] sm:$0xff] }
0x172d   :  { %v1558_v24 = vpack.c.bf16 %v32_v12, %v31_v22 }
0x172e   :  { %v1182_v16 = vadd.f32 %v1181_v15, %v1721_v20  ;;  %v33_v20 = vld [vmem:[%s2123_s1 + $0x70] sm:$0xff]  ;;  %s1286_s1 = sshll.u32 %s1666_s6, 4  ;;  %s1287_s1 = int_to_ptr.vmem [resolvable:$true] %s1286_s1 }
0x172f   :  { %1559 = vmatpush3.bf16.msra.mxu1 %v1558_v24  ;;  %v1561_v26 = vpack.c.bf16 %v34_v25, %v33_v20  ;;  %s1635_s7 = scalar_lea.vmem %s1287_s1, 32  ;;  %p1640_p1 = scmp.lt.s32.totalorder %s1287_s1, %s1287_s1 }
0x1730   :  { %1185 = vrot.lane.b32.xlu1 %v1182_v16, %s1663_s19  ;;  %v1183_v19 = vmul.f32 %v1182_v16, %v1048_v55  ;;  %1560 = vmatprep.subr.bf16.mxu1 %v1665_v23  ;;  %p1636_p0 = scmp.ne.s32.totalorder %s1287_s1, %s1635_s7  ;;  %p1641_p2 = scmp.lt.s32.totalorder %s1635_s7, %s1635_s7 }
0x1732   :  { %p1642_p3 = por %p1641_p2, %p1640_p1 }
0x1733   :  { %1562 = vmatpush3.bf16.msra.mxu1 %v1561_v26 }
0x1734   :  { %p1643_p4 = pnand %p1642_p3, %p1636_p0 }
0x17a2   :  { %v1186_v17 = vpop.permute.xlu1 %1185 }
0x17a3   :  { %v1188_v18 = vmul.f32 %v1186_v17, %v1182_v16 }
0x17a5   :  { %1190 = vrot.lane.b32.xlu0 %v1188_v18, %s1664_s20 }
0x1817   :  { %v1191_v21 = vpop.permute.xlu0 %1190 }
0x1818   :  { %v1193_v52 = vadd.f32 %v1191_v21, %v1183_v19 }
0x181a   :  { %1633 = vtanh.f32 %v1193_v52 }
0x1824   :  { %v1634_v27 = vpop.eup %1633 }
0x1825   :  { %1196 = vrot.lane.b32.xlu1 %v1634_v27, %s1663_s19 }
0x1897   :  { %v1197_v28 = vpop.permute.xlu1 %1196 }
0x1898   :  { %v1199_v29 = vmul.f32 %v1197_v28, %v1182_v16 }
0x189a   :  { %1205 = vrot.lane.b32.xlu0 %v1199_v29, %s1664_s20 }
0x190c   :  { %v1206_v31 = vpop.permute.xlu0 %1205 }
0x190d   :  { %1555 = vmatmul.mubr.msk.f32.vlgmr.msra.gmra.mrb[32].mxu1 %vm48_vm4, %v1206_v31 }
0x19e0   :  { %v1275_v34 = vpop.f32.mrb[32].mxu1 }
0x19e1   :  { %v1276_v35 = vadd.f32 %v1275_v34, %v1203_v32  ;;  %v1556_v37 = vpop.f32.mrb[33].mxu1 }
0x19e3   :  { %1279 = vst [vmem:[#allocation2] sm:$0x3] %v1276_v35 }
0x19e4   :  { %1646 = shalt.err (!%p1643_p4)
}
0x19e5   :  { %s1647_s8 = scalar_lea.hbm %s2124_s2, 32 }
0x19e6   :  { %p1648_p5 = scmp.ne.s32.totalorder %s2124_s2, %s1647_s8  ;;  %p1651_p6 = scmp.lt.u32.totalorder %s1647_s8, %s2124_s2 }
0x19e8   :  { %p1653_p7 = pnand %p1651_p6, %p1648_p5 }
0x19ea   :  { %1656 = shalt.err (!%p1653_p7)
}
0x19eb   :  { %1289 = dma.vmem_to_hbm [thread:$0]  %s1287_s1, 32, %s2124_s2, [#allocation3]  }
0x19ec   :  { %1657 = dma.done.wait [#allocation3], 32  }
0x19ed   :  { %1658 = vsyncadd [#allocation3], 4294967264 }
0x19ee   :  { %1293 = vsyncpa [#allocation3], 1 }

</bundles_post_ra>
